<compile_context>
chip_gen: v7x
topology: tpu7x:2x2x1
jax: 0.10.0
libtpu: 0.0.40
codegen_flags: <defaults>
</compile_context>

<pallas_src>
import functools

import jax
import jax.numpy as jnp
from jax.experimental import pallas as pl
from jax.experimental.pallas import tpu as pltpu


def _round_up(x, m):
    return ((x + m - 1) // m) * m


def _cdiv(a, b):
    return -(-a // b)


def _vmem_capacity_bytes():
    """Physical VMEM per core; conservative fallback if the query is unavailable."""
    try:
        cap = getattr(pltpu.get_tpu_info(), "vmem_capacity_bytes", None)
        if cap:
            return int(cap)
    except Exception:
        pass
    return 64 * 1024 * 1024  # v7x-sized fallback: safe on every generation


_WEIGHT_KEYS = ("we1", "be1", "we2", "be2", "we3", "be3",
                "wd1", "bd1", "wd2", "bd2", "wd3", "bd3")


def prepare_params(params):
    """One-time pad (+bf16 cast) of weights/biases.  Call once, reuse every step."""
    D, H1 = params["we1"].shape
    H2 = params["we2"].shape[1]
    L = params["we3"].shape[1]
    Dp, H1p, H2p, Lp = (_round_up(v, 128) for v in (D, H1, H2, L))
    # TODO(synk): on v6e, hidden/latent dims that are multiples of 256 fill the
    # 256x256 MXU better than the minimum 128 padding used here.

    def pad2(a, rows, cols, dtype):
        a = jnp.asarray(a, dtype)
        return jnp.pad(a, ((0, rows - a.shape[0]), (0, cols - a.shape[1])))

    return {
        "we1": pad2(params["we1"], Dp, H1p, jnp.bfloat16),
        "be1": pad2(params["be1"], 1, H1p, jnp.float32),
        "we2": pad2(params["we2"], H1p, H2p, jnp.bfloat16),
        "be2": pad2(params["be2"], 1, H2p, jnp.float32),
        "we3": pad2(params["we3"], H2p, Lp, jnp.bfloat16),
        "be3": pad2(params["be3"], 1, Lp, jnp.float32),
        "wd1": pad2(params["wd1"], Lp, H2p, jnp.bfloat16),
        "bd1": pad2(params["bd1"], 1, H2p, jnp.float32),
        "wd2": pad2(params["wd2"], H2p, H1p, jnp.bfloat16),
        "bd2": pad2(params["bd2"], 1, H1p, jnp.float32),
        "wd3": pad2(params["wd3"], H1p, Dp, jnp.bfloat16),
        "bd3": pad2(params["bd3"], 1, Dp, jnp.float32),
        "dims": (D, H1, H2, L),
        "pdims": (Dp, H1p, H2p, Lp),
    }


def _ae_kernel(x_ref,
               we1_ref, be1_ref, we2_ref, be2_ref, we3_ref, be3_ref,
               wd1_ref, bd1_ref, wd2_ref, bd2_ref, wd3_ref, bd3_ref,
               recon_ref, code_ref, loss_ref, *, inv_dim):
    x = x_ref[...]                                   # (TB, Dp) f32 tile
    xb = x.astype(jnp.bfloat16)                      # MXU operand

    # ----- encoder: Lin -> ReLU -> Lin -> ReLU -> Lin -----
    h = jnp.dot(xb, we1_ref[...], preferred_element_type=jnp.float32) + be1_ref[...]
    h = jnp.maximum(h, 0.0).astype(jnp.bfloat16)
    h = jnp.dot(h, we2_ref[...], preferred_element_type=jnp.float32) + be2_ref[...]
    h = jnp.maximum(h, 0.0).astype(jnp.bfloat16)
    code = jnp.dot(h, we3_ref[...], preferred_element_type=jnp.float32) + be3_ref[...]

    # ----- decoder: Lin -> ReLU -> Lin -> ReLU -> Lin -----
    g = jnp.dot(code.astype(jnp.bfloat16), wd1_ref[...],
                preferred_element_type=jnp.float32) + bd1_ref[...]
    g = jnp.maximum(g, 0.0).astype(jnp.bfloat16)
    g = jnp.dot(g, wd2_ref[...], preferred_element_type=jnp.float32) + bd2_ref[...]
    g = jnp.maximum(g, 0.0).astype(jnp.bfloat16)
    recon = jnp.dot(g, wd3_ref[...], preferred_element_type=jnp.float32) + bd3_ref[...]

    recon_ref[...] = recon.astype(recon_ref.dtype)   # bf16 writeback
    code_ref[...] = code.astype(code_ref.dtype)      # bf16 writeback

    # ----- fused per-row loss partials (XLU row-reduce rides under MXU work) -----
    # Padded columns of x/recon/code are exactly zero (zero-padded weights/biases),
    # so reducing over the padded width equals reducing over the true width.
    diff = recon - x
    mse_row = jnp.sum(diff * diff, axis=-1, keepdims=True) * inv_dim    # (TB, 1)
    reg_row = jnp.sum(code * code, axis=-1, keepdims=True)              # (TB, 1)
    lane = jax.lax.broadcasted_iota(jnp.int32, loss_ref.shape, 1)
    loss_ref[...] = (jnp.where(lane == 0, mse_row, 0.0)
                     + jnp.where(lane == 1, reg_row, 0.0))


def autoencoder_forward(x, prep, beta=0.0, batch_tile=512):
    """Forward pass.  `prep` comes from prepare_params (weights padded/cast once).

    Returns (total, (mse, reg), (recon, code)); total/mse/reg have shape (B,).
    recon/code are bf16 (loss terms are computed from f32 inside the kernel).
    """
    x = jnp.asarray(x, jnp.float32)
    B, D = x.shape
    D0, H1, H2, L = prep["dims"]
    assert D == D0, "input feature dim does not match prepared params"
    Dp, H1p, H2p, Lp = prep["pdims"]

    # --- batch tiling: balanced, even grid-step count when B > tile (v7x megacore) ---
    TB = min(batch_tile, _round_up(B, 8))
    steps = _cdiv(B, TB)
    if steps > 1:
        if steps % 2 == 1:
            steps += 1
        TB = _round_up(_cdiv(B, steps), 8)
        steps = _cdiv(B, TB)
    Bp = steps * TB

    # --- x: pad only when strictly required; stays f32 (bf16 cast happens in-kernel) ---
    xp = x if (Bp == B and Dp == D) else jnp.pad(x, ((0, Bp - B), (0, Dp - D)))

    weight_args = tuple(prep[k] for k in _WEIGHT_KEYS)
    weight_bytes = sum(int(a.size) * a.dtype.itemsize for a in weight_args)

    kernel = functools.partial(_ae_kernel, inv_dim=1.0 / D)

    def run(single_buffer_weights):
        def wspec(arr):
            if single_buffer_weights:
                # constant index_map + single buffer: weights stay resident, half footprint
                return pl.BlockSpec(arr.shape, lambda i: (0, 0),
                                    pipeline_mode=pl.Buffered(buffer_count=1))
            return pl.BlockSpec(arr.shape, lambda i: (0, 0))

        in_specs = ([pl.BlockSpec((TB, Dp), lambda i: (i, 0))]
                    + [wspec(a) for a in weight_args])
        out_specs = (pl.BlockSpec((TB, Dp), lambda i: (i, 0)),
                     pl.BlockSpec((TB, Lp), lambda i: (i, 0)),
                     pl.BlockSpec((TB, 128), lambda i: (i, 0)))
        out_shape = (jax.ShapeDtypeStruct((Bp, Dp), jnp.bfloat16),   # recon (padded)
                     jax.ShapeDtypeStruct((Bp, Lp), jnp.bfloat16),   # code  (padded)
                     jax.ShapeDtypeStruct((Bp, 128), jnp.float32))   # [mse | reg] slab

        # --- accurate VMEM budget (weights counted per their actual buffer count) ---
        wbuf = 1 if single_buffer_weights else 2
        in_tile = 2 * TB * Dp * 4                                    # x f32, double-buffered
        out_tile = 2 * (TB * Dp * 2 + TB * Lp * 2 + TB * 128 * 4)    # outs, double-buffered
        act = 3 * TB * max(Dp, H1p, H2p, Lp) * 4                     # in-flight f32 activations
        need = wbuf * weight_bytes + in_tile + out_tile + act
        cap = (_vmem_capacity_bytes() * 7) // 8      # headroom for compiler scratch/sems
        vmem_limit = int(min(cap, max(32 * 1024 * 1024, int(need * 1.25))))
        # TODO(synk): if wbuf*weight_bytes approaches `cap` (large D), add a K-tiled
        # grid axis for we1/wd3 instead of keeping them fully VMEM-resident.

        flops = 2 * Bp * (Dp * H1p + H1p * H2p + H2p * Lp
                          + Lp * H2p + H2p * H1p + H1p * Dp)
        bytes_accessed = (weight_bytes + Bp * Dp * 4
                          + Bp * Dp * 2 + Bp * Lp * 2 + Bp * 128 * 4)

        return pl.pallas_call(
            kernel,
            out_shape=out_shape,
            grid=(steps,),
            in_specs=in_specs,
            out_specs=out_specs,
            compiler_params=pltpu.CompilerParams(
                dimension_semantics=("parallel",),
                vmem_limit_bytes=vmem_limit),
            cost_estimate=pl.CostEstimate(
                flops=int(flops), transcendentals=0,
                bytes_accessed=int(bytes_accessed)),
        )(xp, *weight_args)

    try:
        recon_p, code_p, loss_p = run(single_buffer_weights=True)
    except Exception:
        # This jax/Mosaic version rejected Buffered(1); retry with default buffering.
        recon_p, code_p, loss_p = run(single_buffer_weights=False)

    recon = recon_p[:B, :D]
    code = code_p[:B, :L]
    mse = loss_p[:B, 0]
    reg = loss_p[:B, 1]
    total = mse + beta * reg        # beta stays a wrapper scalar: no kernel recompiles
    return total, (mse, reg), (recon, code)


def init_params(key, input_dim, latent_dim, hidden_units):
    """nn.Linear-style init; weights stored as (in_features, out_features)."""
    h1, h2 = hidden_units
    sizes = [("we1", input_dim, h1), ("we2", h1, h2), ("we3", h2, latent_dim),
             ("wd1", latent_dim, h2), ("wd2", h2, h1), ("wd3", h1, input_dim)]
    params = {}
    for name, fan_in, fan_out in sizes:
        key, kw, kb = jax.random.split(key, 3)
        bound = 1.0 / (fan_in ** 0.5)
        params[name] = jax.random.uniform(
            kw, (fan_in, fan_out), jnp.float32, minval=-bound, maxval=bound)
        params["b" + name[1:]] = jax.random.uniform(
            kb, (1, fan_out), jnp.float32, minval=-bound, maxval=bound)
    return params


def _reference_forward(x, p, beta):
    """Pure-JAX reference mirroring the kernel's bf16-operand / f32-accumulate path."""
    def lin(a, w, b):
        return jnp.dot(a.astype(jnp.bfloat16), w.astype(jnp.bfloat16),
                       preferred_element_type=jnp.float32) + b
    h = jax.nn.relu(lin(x, p["we1"], p["be1"]))
    h = jax.nn.relu(lin(h, p["we2"], p["be2"]))
    code = lin(h, p["we3"], p["be3"])
    g = jax.nn.relu(lin(code, p["wd1"], p["bd1"]))
    g = jax.nn.relu(lin(g, p["wd2"], p["bd2"]))
    recon = lin(g, p["wd3"], p["bd3"])
    mse = jnp.mean((recon - x) ** 2, axis=-1)
    reg = jnp.sum(code ** 2, axis=-1)
    return mse + beta * reg, (mse, reg), (recon, code)


if __name__ == "__main__":
    key = jax.random.PRNGKey(0)
    B, D, L = 8, 32, 8
    hidden_units = (16, 16)
    beta = 0.5

    kx, kp = jax.random.split(key)
    x = jax.random.normal(kx, (B, D), jnp.float32)
    params = init_params(kp, D, L, hidden_units)
    prep = prepare_params(params)            # one-time weight padding / bf16 cast

    total, (mse, reg), (recon, code) = autoencoder_forward(x, prep, beta=beta)
    jax.block_until_ready((total, mse, reg, recon, code))

    ref_total, (ref_mse, ref_reg), (ref_recon, ref_code) = _reference_forward(x, params, beta)
    assert jnp.allclose(recon.astype(jnp.float32), ref_recon, atol=2e-2, rtol=2e-2)
    assert jnp.allclose(code.astype(jnp.float32), ref_code, atol=2e-2, rtol=2e-2)
    assert jnp.allclose(mse, ref_mse, atol=2e-2, rtol=2e-2)
    assert jnp.allclose(reg, ref_reg, atol=2e-2, rtol=2e-2)
    assert jnp.allclose(total, ref_total, atol=2e-2, rtol=2e-2)

    print("KERNEL_OK")
</pallas_src>

<mosaic_0001>
module attributes {stable_mosaic.version = 11 : i64} {
  func.func @_ae_kernel(%arg0: i32, %arg1: memref<8x128xf32, #tpu.memory_space<vmem>>, %arg2: memref<128x128xbf16, #tpu.memory_space<vmem>>, %arg3: memref<1x128xf32, #tpu.memory_space<vmem>>, %arg4: memref<128x128xbf16, #tpu.memory_space<vmem>>, %arg5: memref<1x128xf32, #tpu.memory_space<vmem>>, %arg6: memref<128x128xbf16, #tpu.memory_space<vmem>>, %arg7: memref<1x128xf32, #tpu.memory_space<vmem>>, %arg8: memref<128x128xbf16, #tpu.memory_space<vmem>>, %arg9: memref<1x128xf32, #tpu.memory_space<vmem>>, %arg10: memref<128x128xbf16, #tpu.memory_space<vmem>>, %arg11: memref<1x128xf32, #tpu.memory_space<vmem>>, %arg12: memref<128x128xbf16, #tpu.memory_space<vmem>>, %arg13: memref<1x128xf32, #tpu.memory_space<vmem>>, %arg14: memref<8x128xbf16, #tpu.memory_space<vmem>>, %arg15: memref<8x128xbf16, #tpu.memory_space<vmem>>, %arg16: memref<8x128xf32, #tpu.memory_space<vmem>>) attributes {dimension_semantics = [#tpu.dimension_semantics<parallel>], iteration_bounds = array<i64: 1>, scalar_prefetch = 0 : i64, scratch_operands = 0 : i64, tpu.core_type = #tpu.core_type<tc>, window_params = [{transform_indices = @transform_0, window_bounds = array<i64: 8, 128>}, {pipeline_mode = #tpu.pipeline_mode<synchronous>, transform_indices = @transform_1, window_bounds = array<i64: 128, 128>}, {pipeline_mode = #tpu.pipeline_mode<synchronous>, transform_indices = @transform_2, window_bounds = array<i64: 1, 128>}, {pipeline_mode = #tpu.pipeline_mode<synchronous>, transform_indices = @transform_3, window_bounds = array<i64: 128, 128>}, {pipeline_mode = #tpu.pipeline_mode<synchronous>, transform_indices = @transform_4, window_bounds = array<i64: 1, 128>}, {pipeline_mode = #tpu.pipeline_mode<synchronous>, transform_indices = @transform_5, window_bounds = array<i64: 128, 128>}, {pipeline_mode = #tpu.pipeline_mode<synchronous>, transform_indices = @transform_6, window_bounds = array<i64: 1, 128>}, {pipeline_mode = #tpu.pipeline_mode<synchronous>, transform_indices = @transform_7, window_bounds = array<i64: 128, 128>}, {pipeline_mode = #tpu.pipeline_mode<synchronous>, transform_indices = @transform_8, window_bounds = array<i64: 1, 128>}, {pipeline_mode = #tpu.pipeline_mode<synchronous>, transform_indices = @transform_9, window_bounds = array<i64: 128, 128>}, {pipeline_mode = #tpu.pipeline_mode<synchronous>, transform_indices = @transform_10, window_bounds = array<i64: 1, 128>}, {pipeline_mode = #tpu.pipeline_mode<synchronous>, transform_indices = @transform_11, window_bounds = array<i64: 128, 128>}, {pipeline_mode = #tpu.pipeline_mode<synchronous>, transform_indices = @transform_12, window_bounds = array<i64: 1, 128>}, {transform_indices = @transform_13, window_bounds = array<i64: 8, 128>}, {transform_indices = @transform_14, window_bounds = array<i64: 8, 128>}, {transform_indices = @transform_15, window_bounds = array<i64: 8, 128>}]} {
    %c0 = arith.constant 0 : index
    %c0_0 = arith.constant 0 : index
    %0 = vector.load %arg1[%c0, %c0_0] : memref<8x128xf32, #tpu.memory_space<vmem>>, vector<8x128xf32>
    %1 = arith.truncf %0 : vector<8x128xf32> to vector<8x128xbf16>
    %c0_1 = arith.constant 0 : index
    %c0_2 = arith.constant 0 : index
    %2 = vector.load %arg2[%c0_1, %c0_2] : memref<128x128xbf16, #tpu.memory_space<vmem>>, vector<128x128xbf16>
    %cst = arith.constant dense<0.000000e+00> : vector<8x128xf32>
    %3 = tpu.matmul %1, %2, %cst {dimension_numbers = #tpu.dot_dimension_numbers<[1], [0], [0], [1], [0, 0, 1, 1], [], []>} : vector<8x128xbf16>, vector<128x128xbf16>, vector<8x128xf32> -> vector<8x128xf32>
    %c0_3 = arith.constant 0 : index
    %c0_4 = arith.constant 0 : index
    %4 = vector.load %arg3[%c0_3, %c0_4] : memref<1x128xf32, #tpu.memory_space<vmem>>, vector<1x128xf32>
    %5 = vector.broadcast %4 : vector<1x128xf32> to vector<8x128xf32>
    %6 = arith.addf %3, %5 : vector<8x128xf32>
    %cst_5 = arith.constant 0.000000e+00 : f32
    %7 = vector.broadcast %cst_5 : f32 to vector<8x128xf32>
    %8 = arith.maximumf %6, %7 : vector<8x128xf32>
    %9 = arith.truncf %8 : vector<8x128xf32> to vector<8x128xbf16>
    %c0_6 = arith.constant 0 : index
    %c0_7 = arith.constant 0 : index
    %10 = vector.load %arg4[%c0_6, %c0_7] : memref<128x128xbf16, #tpu.memory_space<vmem>>, vector<128x128xbf16>
    %cst_8 = arith.constant dense<0.000000e+00> : vector<8x128xf32>
    %11 = tpu.matmul %9, %10, %cst_8 {dimension_numbers = #tpu.dot_dimension_numbers<[1], [0], [0], [1], [0, 0, 1, 1], [], []>} : vector<8x128xbf16>, vector<128x128xbf16>, vector<8x128xf32> -> vector<8x128xf32>
    %c0_9 = arith.constant 0 : index
    %c0_10 = arith.constant 0 : index
    %12 = vector.load %arg5[%c0_9, %c0_10] : memref<1x128xf32, #tpu.memory_space<vmem>>, vector<1x128xf32>
    %13 = vector.broadcast %12 : vector<1x128xf32> to vector<8x128xf32>
    %14 = arith.addf %11, %13 : vector<8x128xf32>
    %cst_11 = arith.constant 0.000000e+00 : f32
    %15 = vector.broadcast %cst_11 : f32 to vector<8x128xf32>
    %16 = arith.maximumf %14, %15 : vector<8x128xf32>
    %17 = arith.truncf %16 : vector<8x128xf32> to vector<8x128xbf16>
    %c0_12 = arith.constant 0 : index
    %c0_13 = arith.constant 0 : index
    %18 = vector.load %arg6[%c0_12, %c0_13] : memref<128x128xbf16, #tpu.memory_space<vmem>>, vector<128x128xbf16>
    %cst_14 = arith.constant dense<0.000000e+00> : vector<8x128xf32>
    %19 = tpu.matmul %17, %18, %cst_14 {dimension_numbers = #tpu.dot_dimension_numbers<[1], [0], [0], [1], [0, 0, 1, 1], [], []>} : vector<8x128xbf16>, vector<128x128xbf16>, vector<8x128xf32> -> vector<8x128xf32>
    %c0_15 = arith.constant 0 : index
    %c0_16 = arith.constant 0 : index
    %20 = vector.load %arg7[%c0_15, %c0_16] : memref<1x128xf32, #tpu.memory_space<vmem>>, vector<1x128xf32>
    %21 = vector.broadcast %20 : vector<1x128xf32> to vector<8x128xf32>
    %22 = arith.addf %19, %21 : vector<8x128xf32>
    %23 = arith.truncf %22 : vector<8x128xf32> to vector<8x128xbf16>
    %c0_17 = arith.constant 0 : index
    %c0_18 = arith.constant 0 : index
    %24 = vector.load %arg8[%c0_17, %c0_18] : memref<128x128xbf16, #tpu.memory_space<vmem>>, vector<128x128xbf16>
    %cst_19 = arith.constant dense<0.000000e+00> : vector<8x128xf32>
    %25 = tpu.matmul %23, %24, %cst_19 {dimension_numbers = #tpu.dot_dimension_numbers<[1], [0], [0], [1], [0, 0, 1, 1], [], []>} : vector<8x128xbf16>, vector<128x128xbf16>, vector<8x128xf32> -> vector<8x128xf32>
    %c0_20 = arith.constant 0 : index
    %c0_21 = arith.constant 0 : index
    %26 = vector.load %arg9[%c0_20, %c0_21] : memref<1x128xf32, #tpu.memory_space<vmem>>, vector<1x128xf32>
    %27 = vector.broadcast %26 : vector<1x128xf32> to vector<8x128xf32>
    %28 = arith.addf %25, %27 : vector<8x128xf32>
    %cst_22 = arith.constant 0.000000e+00 : f32
    %29 = vector.broadcast %cst_22 : f32 to vector<8x128xf32>
    %30 = arith.maximumf %28, %29 : vector<8x128xf32>
    %31 = arith.truncf %30 : vector<8x128xf32> to vector<8x128xbf16>
    %c0_23 = arith.constant 0 : index
    %c0_24 = arith.constant 0 : index
    %32 = vector.load %arg10[%c0_23, %c0_24] : memref<128x128xbf16, #tpu.memory_space<vmem>>, vector<128x128xbf16>
    %cst_25 = arith.constant dense<0.000000e+00> : vector<8x128xf32>
    %33 = tpu.matmul %31, %32, %cst_25 {dimension_numbers = #tpu.dot_dimension_numbers<[1], [0], [0], [1], [0, 0, 1, 1], [], []>} : vector<8x128xbf16>, vector<128x128xbf16>, vector<8x128xf32> -> vector<8x128xf32>
    %c0_26 = arith.constant 0 : index
    %c0_27 = arith.constant 0 : index
    %34 = vector.load %arg11[%c0_26, %c0_27] : memref<1x128xf32, #tpu.memory_space<vmem>>, vector<1x128xf32>
    %35 = vector.broadcast %34 : vector<1x128xf32> to vector<8x128xf32>
    %36 = arith.addf %33, %35 : vector<8x128xf32>
    %cst_28 = arith.constant 0.000000e+00 : f32
    %37 = vector.broadcast %cst_28 : f32 to vector<8x128xf32>
    %38 = arith.maximumf %36, %37 : vector<8x128xf32>
    %39 = arith.truncf %38 : vector<8x128xf32> to vector<8x128xbf16>
    %c0_29 = arith.constant 0 : index
    %c0_30 = arith.constant 0 : index
    %40 = vector.load %arg12[%c0_29, %c0_30] : memref<128x128xbf16, #tpu.memory_space<vmem>>, vector<128x128xbf16>
    %cst_31 = arith.constant dense<0.000000e+00> : vector<8x128xf32>
    %41 = tpu.matmul %39, %40, %cst_31 {dimension_numbers = #tpu.dot_dimension_numbers<[1], [0], [0], [1], [0, 0, 1, 1], [], []>} : vector<8x128xbf16>, vector<128x128xbf16>, vector<8x128xf32> -> vector<8x128xf32>
    %c0_32 = arith.constant 0 : index
    %c0_33 = arith.constant 0 : index
    %42 = vector.load %arg13[%c0_32, %c0_33] : memref<1x128xf32, #tpu.memory_space<vmem>>, vector<1x128xf32>
    %43 = vector.broadcast %42 : vector<1x128xf32> to vector<8x128xf32>
    %44 = arith.addf %41, %43 : vector<8x128xf32>
    %45 = arith.truncf %44 : vector<8x128xf32> to vector<8x128xbf16>
    %c0_34 = arith.constant 0 : index
    %c0_35 = arith.constant 0 : index
    %46 = vector.load %arg14[%c0_34, %c0_35] : memref<8x128xbf16, #tpu.memory_space<vmem>>, vector<8x128xbf16>
    tpu.vector_store %arg14[%c0_34, %c0_35], %45 {strides = array<i32>} : memref<8x128xbf16, #tpu.memory_space<vmem>>, vector<8x128xbf16>,
    %47 = arith.truncf %22 : vector<8x128xf32> to vector<8x128xbf16>
    %c0_36 = arith.constant 0 : index
    %c0_37 = arith.constant 0 : index
    %48 = vector.load %arg15[%c0_36, %c0_37] : memref<8x128xbf16, #tpu.memory_space<vmem>>, vector<8x128xbf16>
    tpu.vector_store %arg15[%c0_36, %c0_37], %47 {strides = array<i32>} : memref<8x128xbf16, #tpu.memory_space<vmem>>, vector<8x128xbf16>,
    %49 = arith.subf %44, %0 : vector<8x128xf32>
    %50 = arith.mulf %49, %49 : vector<8x128xf32>
    %cst_38 = arith.constant dense<0.000000e+00> : vector<8xf32>
    %51 = vector.multi_reduction <add>, %50, %cst_38 [1] : vector<8x128xf32> to vector<8xf32>
    %52 = vector.shape_cast %51 : vector<8xf32> to vector<8x1xf32>
    %cst_39 = arith.constant 3.125000e-02 : f32
    %53 = vector.broadcast %cst_39 : f32 to vector<8x1xf32>
    %54 = arith.mulf %52, %53 : vector<8x1xf32>
    %55 = arith.mulf %22, %22 : vector<8x128xf32>
    %cst_40 = arith.constant dense<0.000000e+00> : vector<8xf32>
    %56 = vector.multi_reduction <add>, %55, %cst_40 [1] : vector<8x128xf32> to vector<8xf32>
    %57 = vector.shape_cast %56 : vector<8xf32> to vector<8x1xf32>
    %58 = tpu.iota {dimensions = array<i32: 1>} : vector<8x128xi32>
    %c0_i32 = arith.constant 0 : i32
    %59 = vector.broadcast %c0_i32 : i32 to vector<8x128xi32>
    %60 = arith.cmpi eq, %58, %59 : vector<8x128xi32>
    %cst_41 = arith.constant 0.000000e+00 : f32
    %61 = vector.shape_cast %54 : vector<8x1xf32> to vector<8x1xf32>
    %62 = vector.broadcast %61 : vector<8x1xf32> to vector<8x128xf32>
    %63 = vector.broadcast %cst_41 : f32 to vector<8x128xf32>
    %64 = arith.select %60, %62, %63 : vector<8x128xi1>, vector<8x128xf32>
    %c1_i32 = arith.constant 1 : i32
    %65 = vector.broadcast %c1_i32 : i32 to vector<8x128xi32>
    %66 = arith.cmpi eq, %58, %65 : vector<8x128xi32>
    %cst_42 = arith.constant 0.000000e+00 : f32
    %67 = vector.shape_cast %57 : vector<8x1xf32> to vector<8x1xf32>
    %68 = vector.broadcast %67 : vector<8x1xf32> to vector<8x128xf32>
    %69 = vector.broadcast %cst_42 : f32 to vector<8x128xf32>
    %70 = arith.select %66, %68, %69 : vector<8x128xi1>, vector<8x128xf32>
    %71 = arith.addf %64, %70 : vector<8x128xf32>
    %c0_43 = arith.constant 0 : index
    %c0_44 = arith.constant 0 : index
    %72 = vector.load %arg16[%c0_43, %c0_44] : memref<8x128xf32, #tpu.memory_space<vmem>>, vector<8x128xf32>
    tpu.vector_store %arg16[%c0_43, %c0_44], %71 {strides = array<i32>} : memref<8x128xf32, #tpu.memory_space<vmem>>, vector<8x128xf32>,
    return
  }
  func.func @transform_0(%arg0: i32) -> (i32, i32) {
    %c0_i32 = arith.constant 0 : i32
    %c0_i32_0 = arith.constant 0 : i32
    return %arg0, %c0_i32 : i32, i32
  }
  func.func @transform_1(%arg0: i32) -> (i32, i32) {
    %c0_i32 = arith.constant 0 : i32
    %c0_i32_0 = arith.constant 0 : i32
    %c0_i32_1 = arith.constant 0 : i32
    return %c0_i32, %c0_i32_0 : i32, i32
  }
  func.func @transform_2(%arg0: i32) -> (i32, i32) {
    %c0_i32 = arith.constant 0 : i32
    %c0_i32_0 = arith.constant 0 : i32
    %c0_i32_1 = arith.constant 0 : i32
    return %c0_i32, %c0_i32_0 : i32, i32
  }
  func.func @transform_3(%arg0: i32) -> (i32, i32) {
    %c0_i32 = arith.constant 0 : i32
    %c0_i32_0 = arith.constant 0 : i32
    %c0_i32_1 = arith.constant 0 : i32
    return %c0_i32, %c0_i32_0 : i32, i32
  }
  func.func @transform_4(%arg0: i32) -> (i32, i32) {
    %c0_i32 = arith.constant 0 : i32
    %c0_i32_0 = arith.constant 0 : i32
    %c0_i32_1 = arith.constant 0 : i32
    return %c0_i32, %c0_i32_0 : i32, i32
  }
  func.func @transform_5(%arg0: i32) -> (i32, i32) {
    %c0_i32 = arith.constant 0 : i32
    %c0_i32_0 = arith.constant 0 : i32
    %c0_i32_1 = arith.constant 0 : i32
    return %c0_i32, %c0_i32_0 : i32, i32
  }
  func.func @transform_6(%arg0: i32) -> (i32, i32) {
    %c0_i32 = arith.constant 0 : i32
    %c0_i32_0 = arith.constant 0 : i32
    %c0_i32_1 = arith.constant 0 : i32
    return %c0_i32, %c0_i32_0 : i32, i32
  }
  func.func @transform_7(%arg0: i32) -> (i32, i32) {
    %c0_i32 = arith.constant 0 : i32
    %c0_i32_0 = arith.constant 0 : i32
    %c0_i32_1 = arith.constant 0 : i32
    return %c0_i32, %c0_i32_0 : i32, i32
  }
  func.func @transform_8(%arg0: i32) -> (i32, i32) {
    %c0_i32 = arith.constant 0 : i32
    %c0_i32_0 = arith.constant 0 : i32
    %c0_i32_1 = arith.constant 0 : i32
    return %c0_i32, %c0_i32_0 : i32, i32
  }
  func.func @transform_9(%arg0: i32) -> (i32, i32) {
    %c0_i32 = arith.constant 0 : i32
    %c0_i32_0 = arith.constant 0 : i32
    %c0_i32_1 = arith.constant 0 : i32
    return %c0_i32, %c0_i32_0 : i32, i32
  }
  func.func @transform_10(%arg0: i32) -> (i32, i32) {
    %c0_i32 = arith.constant 0 : i32
    %c0_i32_0 = arith.constant 0 : i32
    %c0_i32_1 = arith.constant 0 : i32
    return %c0_i32, %c0_i32_0 : i32, i32
  }
  func.func @transform_11(%arg0: i32) -> (i32, i32) {
    %c0_i32 = arith.constant 0 : i32
    %c0_i32_0 = arith.constant 0 : i32
    %c0_i32_1 = arith.constant 0 : i32
    return %c0_i32, %c0_i32_0 : i32, i32
  }
  func.func @transform_12(%arg0: i32) -> (i32, i32) {
    %c0_i32 = arith.constant 0 : i32
    %c0_i32_0 = arith.constant 0 : i32
    %c0_i32_1 = arith.constant 0 : i32
    return %c0_i32, %c0_i32_0 : i32, i32
  }
  func.func @transform_13(%arg0: i32) -> (i32, i32) {
    %c0_i32 = arith.constant 0 : i32
    %c0_i32_0 = arith.constant 0 : i32
    return %arg0, %c0_i32 : i32, i32
  }
  func.func @transform_14(%arg0: i32) -> (i32, i32) {
    %c0_i32 = arith.constant 0 : i32
    %c0_i32_0 = arith.constant 0 : i32
    return %arg0, %c0_i32 : i32, i32
  }
  func.func @transform_15(%arg0: i32) -> (i32, i32) {
    %c0_i32 = arith.constant 0 : i32
    %c0_i32_0 = arith.constant 0 : i32
    return %arg0, %c0_i32 : i32, i32
  }
}

module attributes {stable_mosaic.version = 11 : i64} {
  func.func @_ae_kernel(%arg0: i32, %arg1: memref<8x128xf32, #tpu.memory_space<vmem>>, %arg2: memref<128x128xbf16, #tpu.memory_space<vmem>>, %arg3: memref<1x128xf32, #tpu.memory_space<vmem>>, %arg4: memref<128x128xbf16, #tpu.memory_space<vmem>>, %arg5: memref<1x128xf32, #tpu.memory_space<vmem>>, %arg6: memref<128x128xbf16, #tpu.memory_space<vmem>>, %arg7: memref<1x128xf32, #tpu.memory_space<vmem>>, %arg8: memref<128x128xbf16, #tpu.memory_space<vmem>>, %arg9: memref<1x128xf32, #tpu.memory_space<vmem>>, %arg10: memref<128x128xbf16, #tpu.memory_space<vmem>>, %arg11: memref<1x128xf32, #tpu.memory_space<vmem>>, %arg12: memref<128x128xbf16, #tpu.memory_space<vmem>>, %arg13: memref<1x128xf32, #tpu.memory_space<vmem>>, %arg14: memref<8x128xbf16, #tpu.memory_space<vmem>>, %arg15: memref<8x128xbf16, #tpu.memory_space<vmem>>, %arg16: memref<8x128xf32, #tpu.memory_space<vmem>>) attributes {dimension_semantics = [#tpu.dimension_semantics<parallel>], iteration_bounds = array<i64: 1>, scalar_prefetch = 0 : i64, scratch_operands = 0 : i64, tpu.core_type = #tpu.core_type<tc>, window_params = [{transform_indices = @transform_0, window_bounds = array<i64: 8, 128>}, {pipeline_mode = #tpu.pipeline_mode<synchronous>, transform_indices = @transform_1, window_bounds = array<i64: 128, 128>}, {pipeline_mode = #tpu.pipeline_mode<synchronous>, transform_indices = @transform_2, window_bounds = array<i64: 1, 128>}, {pipeline_mode = #tpu.pipeline_mode<synchronous>, transform_indices = @transform_3, window_bounds = array<i64: 128, 128>}, {pipeline_mode = #tpu.pipeline_mode<synchronous>, transform_indices = @transform_4, window_bounds = array<i64: 1, 128>}, {pipeline_mode = #tpu.pipeline_mode<synchronous>, transform_indices = @transform_5, window_bounds = array<i64: 128, 128>}, {pipeline_mode = #tpu.pipeline_mode<synchronous>, transform_indices = @transform_6, window_bounds = array<i64: 1, 128>}, {pipeline_mode = #tpu.pipeline_mode<synchronous>, transform_indices = @transform_7, window_bounds = array<i64: 128, 128>}, {pipeline_mode = #tpu.pipeline_mode<synchronous>, transform_indices = @transform_8, window_bounds = array<i64: 1, 128>}, {pipeline_mode = #tpu.pipeline_mode<synchronous>, transform_indices = @transform_9, window_bounds = array<i64: 128, 128>}, {pipeline_mode = #tpu.pipeline_mode<synchronous>, transform_indices = @transform_10, window_bounds = array<i64: 1, 128>}, {pipeline_mode = #tpu.pipeline_mode<synchronous>, transform_indices = @transform_11, window_bounds = array<i64: 128, 128>}, {pipeline_mode = #tpu.pipeline_mode<synchronous>, transform_indices = @transform_12, window_bounds = array<i64: 1, 128>}, {transform_indices = @transform_13, window_bounds = array<i64: 8, 128>}, {transform_indices = @transform_14, window_bounds = array<i64: 8, 128>}, {transform_indices = @transform_15, window_bounds = array<i64: 8, 128>}]} {
    %c0 = arith.constant 0 : index
    %c0_0 = arith.constant 0 : index
    %0 = vector.load %arg1[%c0, %c0_0] : memref<8x128xf32, #tpu.memory_space<vmem>>, vector<8x128xf32>
    %1 = arith.truncf %0 : vector<8x128xf32> to vector<8x128xbf16>
    %c0_1 = arith.constant 0 : index
    %c0_2 = arith.constant 0 : index
    %2 = vector.load %arg2[%c0_1, %c0_2] : memref<128x128xbf16, #tpu.memory_space<vmem>>, vector<128x128xbf16>
    %cst = arith.constant dense<0.000000e+00> : vector<8x128xf32>
    %3 = tpu.matmul %1, %2, %cst {dimension_numbers = #tpu.dot_dimension_numbers<[1], [0], [0], [1], [0, 0, 1, 1], [], []>} : vector<8x128xbf16>, vector<128x128xbf16>, vector<8x128xf32> -> vector<8x128xf32>
    %c0_3 = arith.constant 0 : index
    %c0_4 = arith.constant 0 : index
    %4 = vector.load %arg3[%c0_3, %c0_4] : memref<1x128xf32, #tpu.memory_space<vmem>>, vector<1x128xf32>
    %5 = vector.broadcast %4 : vector<1x128xf32> to vector<8x128xf32>
    %6 = arith.addf %3, %5 : vector<8x128xf32>
    %cst_5 = arith.constant 0.000000e+00 : f32
    %7 = vector.broadcast %cst_5 : f32 to vector<8x128xf32>
    %8 = arith.maximumf %6, %7 : vector<8x128xf32>
    %9 = arith.truncf %8 : vector<8x128xf32> to vector<8x128xbf16>
    %c0_6 = arith.constant 0 : index
    %c0_7 = arith.constant 0 : index
    %10 = vector.load %arg4[%c0_6, %c0_7] : memref<128x128xbf16, #tpu.memory_space<vmem>>, vector<128x128xbf16>
    %cst_8 = arith.constant dense<0.000000e+00> : vector<8x128xf32>
    %11 = tpu.matmul %9, %10, %cst_8 {dimension_numbers = #tpu.dot_dimension_numbers<[1], [0], [0], [1], [0, 0, 1, 1], [], []>} : vector<8x128xbf16>, vector<128x128xbf16>, vector<8x128xf32> -> vector<8x128xf32>
    %c0_9 = arith.constant 0 : index
    %c0_10 = arith.constant 0 : index
    %12 = vector.load %arg5[%c0_9, %c0_10] : memref<1x128xf32, #tpu.memory_space<vmem>>, vector<1x128xf32>
    %13 = vector.broadcast %12 : vector<1x128xf32> to vector<8x128xf32>
    %14 = arith.addf %11, %13 : vector<8x128xf32>
    %cst_11 = arith.constant 0.000000e+00 : f32
    %15 = vector.broadcast %cst_11 : f32 to vector<8x128xf32>
    %16 = arith.maximumf %14, %15 : vector<8x128xf32>
    %17 = arith.truncf %16 : vector<8x128xf32> to vector<8x128xbf16>
    %c0_12 = arith.constant 0 : index
    %c0_13 = arith.constant 0 : index
    %18 = vector.load %arg6[%c0_12, %c0_13] : memref<128x128xbf16, #tpu.memory_space<vmem>>, vector<128x128xbf16>
    %cst_14 = arith.constant dense<0.000000e+00> : vector<8x128xf32>
    %19 = tpu.matmul %17, %18, %cst_14 {dimension_numbers = #tpu.dot_dimension_numbers<[1], [0], [0], [1], [0, 0, 1, 1], [], []>} : vector<8x128xbf16>, vector<128x128xbf16>, vector<8x128xf32> -> vector<8x128xf32>
    %c0_15 = arith.constant 0 : index
    %c0_16 = arith.constant 0 : index
    %20 = vector.load %arg7[%c0_15, %c0_16] : memref<1x128xf32, #tpu.memory_space<vmem>>, vector<1x128xf32>
    %21 = vector.broadcast %20 : vector<1x128xf32> to vector<8x128xf32>
    %22 = arith.addf %19, %21 : vector<8x128xf32>
    %23 = arith.truncf %22 : vector<8x128xf32> to vector<8x128xbf16>
    %c0_17 = arith.constant 0 : index
    %c0_18 = arith.constant 0 : index
    %24 = vector.load %arg8[%c0_17, %c0_18] : memref<128x128xbf16, #tpu.memory_space<vmem>>, vector<128x128xbf16>
    %cst_19 = arith.constant dense<0.000000e+00> : vector<8x128xf32>
    %25 = tpu.matmul %23, %24, %cst_19 {dimension_numbers = #tpu.dot_dimension_numbers<[1], [0], [0], [1], [0, 0, 1, 1], [], []>} : vector<8x128xbf16>, vector<128x128xbf16>, vector<8x128xf32> -> vector<8x128xf32>
    %c0_20 = arith.constant 0 : index
    %c0_21 = arith.constant 0 : index
    %26 = vector.load %arg9[%c0_20, %c0_21] : memref<1x128xf32, #tpu.memory_space<vmem>>, vector<1x128xf32>
    %27 = vector.broadcast %26 : vector<1x128xf32> to vector<8x128xf32>
    %28 = arith.addf %25, %27 : vector<8x128xf32>
    %cst_22 = arith.constant 0.000000e+00 : f32
    %29 = vector.broadcast %cst_22 : f32 to vector<8x128xf32>
    %30 = arith.maximumf %28, %29 : vector<8x128xf32>
    %31 = arith.truncf %30 : vector<8x128xf32> to vector<8x128xbf16>
    %c0_23 = arith.constant 0 : index
    %c0_24 = arith.constant 0 : index
    %32 = vector.load %arg10[%c0_23, %c0_24] : memref<128x128xbf16, #tpu.memory_space<vmem>>, vector<128x128xbf16>
    %cst_25 = arith.constant dense<0.000000e+00> : vector<8x128xf32>
    %33 = tpu.matmul %31, %32, %cst_25 {dimension_numbers = #tpu.dot_dimension_numbers<[1], [0], [0], [1], [0, 0, 1, 1], [], []>} : vector<8x128xbf16>, vector<128x128xbf16>, vector<8x128xf32> -> vector<8x128xf32>
    %c0_26 = arith.constant 0 : index
    %c0_27 = arith.constant 0 : index
    %34 = vector.load %arg11[%c0_26, %c0_27] : memref<1x128xf32, #tpu.memory_space<vmem>>, vector<1x128xf32>
    %35 = vector.broadcast %34 : vector<1x128xf32> to vector<8x128xf32>
    %36 = arith.addf %33, %35 : vector<8x128xf32>
    %cst_28 = arith.constant 0.000000e+00 : f32
    %37 = vector.broadcast %cst_28 : f32 to vector<8x128xf32>
    %38 = arith.maximumf %36, %37 : vector<8x128xf32>
    %39 = arith.truncf %38 : vector<8x128xf32> to vector<8x128xbf16>
    %c0_29 = arith.constant 0 : index
    %c0_30 = arith.constant 0 : index
    %40 = vector.load %arg12[%c0_29, %c0_30] : memref<128x128xbf16, #tpu.memory_space<vmem>>, vector<128x128xbf16>
    %cst_31 = arith.constant dense<0.000000e+00> : vector<8x128xf32>
    %41 = tpu.matmul %39, %40, %cst_31 {dimension_numbers = #tpu.dot_dimension_numbers<[1], [0], [0], [1], [0, 0, 1, 1], [], []>} : vector<8x128xbf16>, vector<128x128xbf16>, vector<8x128xf32> -> vector<8x128xf32>
    %c0_32 = arith.constant 0 : index
    %c0_33 = arith.constant 0 : index
    %42 = vector.load %arg13[%c0_32, %c0_33] : memref<1x128xf32, #tpu.memory_space<vmem>>, vector<1x128xf32>
    %43 = vector.broadcast %42 : vector<1x128xf32> to vector<8x128xf32>
    %44 = arith.addf %41, %43 : vector<8x128xf32>
    %45 = arith.truncf %44 : vector<8x128xf32> to vector<8x128xbf16>
    %c0_34 = arith.constant 0 : index
    %c0_35 = arith.constant 0 : index
    %46 = vector.load %arg14[%c0_34, %c0_35] : memref<8x128xbf16, #tpu.memory_space<vmem>>, vector<8x128xbf16>
    tpu.vector_store %arg14[%c0_34, %c0_35], %45 {strides = array<i32>} : memref<8x128xbf16, #tpu.memory_space<vmem>>, vector<8x128xbf16>,
    %47 = arith.truncf %22 : vector<8x128xf32> to vector<8x128xbf16>
    %c0_36 = arith.constant 0 : index
    %c0_37 = arith.constant 0 : index
    %48 = vector.load %arg15[%c0_36, %c0_37] : memref<8x128xbf16, #tpu.memory_space<vmem>>, vector<8x128xbf16>
    tpu.vector_store %arg15[%c0_36, %c0_37], %47 {strides = array<i32>} : memref<8x128xbf16, #tpu.memory_space<vmem>>, vector<8x128xbf16>,
    %49 = arith.subf %44, %0 : vector<8x128xf32>
    %50 = arith.mulf %49, %49 : vector<8x128xf32>
    %cst_38 = arith.constant dense<0.000000e+00> : vector<8xf32>
    %51 = vector.multi_reduction <add>, %50, %cst_38 [1] : vector<8x128xf32> to vector<8xf32>
    %52 = vector.shape_cast %51 : vector<8xf32> to vector<8x1xf32>
    %cst_39 = arith.constant 3.125000e-02 : f32
    %53 = vector.broadcast %cst_39 : f32 to vector<8x1xf32>
    %54 = arith.mulf %52, %53 : vector<8x1xf32>
    %55 = arith.mulf %22, %22 : vector<8x128xf32>
    %cst_40 = arith.constant dense<0.000000e+00> : vector<8xf32>
    %56 = vector.multi_reduction <add>, %55, %cst_40 [1] : vector<8x128xf32> to vector<8xf32>
    %57 = vector.shape_cast %56 : vector<8xf32> to vector<8x1xf32>
    %58 = tpu.iota {dimensions = array<i32: 1>} : vector<8x128xi32>
    %c0_i32 = arith.constant 0 : i32
    %59 = vector.broadcast %c0_i32 : i32 to vector<8x128xi32>
    %60 = arith.cmpi eq, %58, %59 : vector<8x128xi32>
    %cst_41 = arith.constant 0.000000e+00 : f32
    %61 = vector.shape_cast %54 : vector<8x1xf32> to vector<8x1xf32>
    %62 = vector.broadcast %61 : vector<8x1xf32> to vector<8x128xf32>
    %63 = vector.broadcast %cst_41 : f32 to vector<8x128xf32>
    %64 = arith.select %60, %62, %63 : vector<8x128xi1>, vector<8x128xf32>
    %c1_i32 = arith.constant 1 : i32
    %65 = vector.broadcast %c1_i32 : i32 to vector<8x128xi32>
    %66 = arith.cmpi eq, %58, %65 : vector<8x128xi32>
    %cst_42 = arith.constant 0.000000e+00 : f32
    %67 = vector.shape_cast %57 : vector<8x1xf32> to vector<8x1xf32>
    %68 = vector.broadcast %67 : vector<8x1xf32> to vector<8x128xf32>
    %69 = vector.broadcast %cst_42 : f32 to vector<8x128xf32>
    %70 = arith.select %66, %68, %69 : vector<8x128xi1>, vector<8x128xf32>
    %71 = arith.addf %64, %70 : vector<8x128xf32>
    %c0_43 = arith.constant 0 : index
    %c0_44 = arith.constant 0 : index
    %72 = vector.load %arg16[%c0_43, %c0_44] : memref<8x128xf32, #tpu.memory_space<vmem>>, vector<8x128xf32>
    tpu.vector_store %arg16[%c0_43, %c0_44], %71 {strides = array<i32>} : memref<8x128xf32, #tpu.memory_space<vmem>>, vector<8x128xf32>,
    return
  }
  func.func @transform_0(%arg0: i32) -> (i32, i32) {
    %c0_i32 = arith.constant 0 : i32
    %c0_i32_0 = arith.constant 0 : i32
    return %arg0, %c0_i32 : i32, i32
  }
  func.func @transform_1(%arg0: i32) -> (i32, i32) {
    %c0_i32 = arith.constant 0 : i32
    %c0_i32_0 = arith.constant 0 : i32
    %c0_i32_1 = arith.constant 0 : i32
    return %c0_i32, %c0_i32_0 : i32, i32
  }
  func.func @transform_2(%arg0: i32) -> (i32, i32) {
    %c0_i32 = arith.constant 0 : i32
    %c0_i32_0 = arith.constant 0 : i32
    %c0_i32_1 = arith.constant 0 : i32
    return %c0_i32, %c0_i32_0 : i32, i32
  }
  func.func @transform_3(%arg0: i32) -> (i32, i32) {
    %c0_i32 = arith.constant 0 : i32
    %c0_i32_0 = arith.constant 0 : i32
    %c0_i32_1 = arith.constant 0 : i32
    return %c0_i32, %c0_i32_0 : i32, i32
  }
  func.func @transform_4(%arg0: i32) -> (i32, i32) {
    %c0_i32 = arith.constant 0 : i32
    %c0_i32_0 = arith.constant 0 : i32
    %c0_i32_1 = arith.constant 0 : i32
    return %c0_i32, %c0_i32_0 : i32, i32
  }
  func.func @transform_5(%arg0: i32) -> (i32, i32) {
    %c0_i32 = arith.constant 0 : i32
    %c0_i32_0 = arith.constant 0 : i32
    %c0_i32_1 = arith.constant 0 : i32
    return %c0_i32, %c0_i32_0 : i32, i32
  }
  func.func @transform_6(%arg0: i32) -> (i32, i32) {
    %c0_i32 = arith.constant 0 : i32
    %c0_i32_0 = arith.constant 0 : i32
    %c0_i32_1 = arith.constant 0 : i32
    return %c0_i32, %c0_i32_0 : i32, i32
  }
  func.func @transform_7(%arg0: i32) -> (i32, i32) {
    %c0_i32 = arith.constant 0 : i32
    %c0_i32_0 = arith.constant 0 : i32
    %c0_i32_1 = arith.constant 0 : i32
    return %c0_i32, %c0_i32_0 : i32, i32
  }
  func.func @transform_8(%arg0: i32) -> (i32, i32) {
    %c0_i32 = arith.constant 0 : i32
    %c0_i32_0 = arith.constant 0 : i32
    %c0_i32_1 = arith.constant 0 : i32
    return %c0_i32, %c0_i32_0 : i32, i32
  }
  func.func @transform_9(%arg0: i32) -> (i32, i32) {
    %c0_i32 = arith.constant 0 : i32
    %c0_i32_0 = arith.constant 0 : i32
    %c0_i32_1 = arith.constant 0 : i32
    return %c0_i32, %c0_i32_0 : i32, i32
  }
  func.func @transform_10(%arg0: i32) -> (i32, i32) {
    %c0_i32 = arith.constant 0 : i32
    %c0_i32_0 = arith.constant 0 : i32
    %c0_i32_1 = arith.constant 0 : i32
    return %c0_i32, %c0_i32_0 : i32, i32
  }
  func.func @transform_11(%arg0: i32) -> (i32, i32) {
    %c0_i32 = arith.constant 0 : i32
    %c0_i32_0 = arith.constant 0 : i32
    %c0_i32_1 = arith.constant 0 : i32
    return %c0_i32, %c0_i32_0 : i32, i32
  }
  func.func @transform_12(%arg0: i32) -> (i32, i32) {
    %c0_i32 = arith.constant 0 : i32
    %c0_i32_0 = arith.constant 0 : i32
    %c0_i32_1 = arith.constant 0 : i32
    return %c0_i32, %c0_i32_0 : i32, i32
  }
  func.func @transform_13(%arg0: i32) -> (i32, i32) {
    %c0_i32 = arith.constant 0 : i32
    %c0_i32_0 = arith.constant 0 : i32
    return %arg0, %c0_i32 : i32, i32
  }
  func.func @transform_14(%arg0: i32) -> (i32, i32) {
    %c0_i32 = arith.constant 0 : i32
    %c0_i32_0 = arith.constant 0 : i32
    return %arg0, %c0_i32 : i32, i32
  }
  func.func @transform_15(%arg0: i32) -> (i32, i32) {
    %c0_i32 = arith.constant 0 : i32
    %c0_i32_0 = arith.constant 0 : i32
    return %arg0, %c0_i32 : i32, i32
  }
}

</mosaic_0001>

<bundles_post_ra>
// kernel: tpu_custom_call.1
= control target key start
LH: loop header
LB: loop body
LE: loop exit
PB: predicated region body
PF: predicated region fallthrough
CT: control target
= control target key end

     0   :  { %s1727_s0 = inlined_call_operand.hbm [shape: f32[8,128], index: 0, kind: input, shape index: {}]   ;;  %s1728_s1 = inlined_call_operand.hbm [shape: bf16[128,128], index: 1, kind: input, shape index: {}]   ;;  %s1729_s2 = inlined_call_operand.vmem [shape: f32[1,128], index: 2, kind: input, shape index: {}]   ;;  %s1730_s3 = inlined_call_operand.hbm [shape: bf16[128,128], index: 3, kind: input, shape index: {}]   ;;  %s1731_s4 = inlined_call_operand.vmem [shape: f32[1,128], index: 4, kind: input, shape index: {}]   ;;  %s1732_s5 = inlined_call_operand.hbm [shape: bf16[128,128], index: 5, kind: input, shape index: {}]   ;;  %s1733_s6 = inlined_call_operand.vmem [shape: f32[1,128], index: 6, kind: input, shape index: {}]   ;;  %s1734_s7 = inlined_call_operand.hbm [shape: bf16[128,128], index: 7, kind: input, shape index: {}]   ;;  %s1735_s8 = inlined_call_operand.vmem [shape: f32[1,128], index: 8, kind: input, shape index: {}]   ;;  %s1736_s9 = inlined_call_operand.hbm [shape: bf16[128,128], index: 9, kind: input, shape index: {}]   ;;  %s1737_s10 = inlined_call_operand.vmem [shape: f32[1,128], index: 10, kind: input, shape index: {}]   ;;  %s1738_s11 = inlined_call_operand.hbm [shape: bf16[128,128], index: 11, kind: input, shape index: {}]   ;;  %s1739_s12 = inlined_call_operand.vmem [shape: f32[1,128], index: 12, kind: input, shape index: {}]   ;;  %s1740_s13 = inlined_call_operand.hbm [shape: bf16[8,128], index: 13, kind: output, shape index: {0}]   ;;  %s1741_s14 = inlined_call_operand.hbm [shape: bf16[8,128], index: 14, kind: output, shape index: {1}]   ;;  %s1742_s15 = inlined_call_operand.hbm [shape: f32[8,128], index: 15, kind: output, shape index: {2}]  }
   0x1   :  { %1744 = sst [smem:[#allocation24_spill]] %s1742_s15 }
   0x2   :  { %21 = vsyncpa [#allocation3], 0 }
   0x3   :  { %22 = vsyncpa [#allocation6], 0 }
   0x4   :  { %23 = vsyncpa [#allocation9], 0 }
   0x5   :  { %24 = vsyncpa [#allocation12], 0 }
   0x6   :  { %25 = vsyncpa [#allocation4], 0 }
   0x7   :  { %26 = vsyncpa [#allocation16], 0  ;;  %s1406_s18 = smov [#allocation5]   ;;  %s1174_s22 = scalar_lea.hbm %s1728_s1, 1024 }
   0x8   :  { %s42_s19 = sshll.u32 %s1406_s18, 4  ;;  %p1175_p0 = scmp.ne.s32.totalorder %s1728_s1, %s1174_s22  ;;  %s43_s19 = int_to_ptr.vmem [resolvable:$true] %s42_s19 }
   0x9   :  { %p1178_p1 = scmp.lt.u32.totalorder %s1174_s22, %s1728_s1 }
   0xb   :  { %p1180_p2 = pnand %p1178_p1, %p1175_p0 }
   0xd   :  { %1183 = shalt.err (!%p1180_p2)
}
   0xe   :  { %s1184_s27 = scalar_lea.vmem %s43_s19, 1024  ;;  %p1189_p4 = scmp.lt.s32.totalorder %s43_s19, %s43_s19 }
   0xf   :  { %p1185_p3 = scmp.ne.s32.totalorder %s43_s19, %s1184_s27  ;;  %p1190_p5 = scmp.lt.s32.totalorder %s1184_s27, %s1184_s27 }
  0x11   :  { %p1191_p6 = por %p1190_p5, %p1189_p4 }
  0x13   :  { %p1192_p7 = pnand %p1191_p6, %p1185_p3 }
  0x15   :  { %1195 = shalt.err (!%p1192_p7)
}
  0x16   :  { %s1407_s28 = smov 64   ;;  %s1408_s29 = smov 4  }
  0x17   :  { %48 = dma.hbm_to_vmem [thread:$0]  %s1728_s1, 1024, %s43_s19, [#allocation6], %s1407_s28, %s1407_s28, %s1408_s29  }
  0x18   :  { %s1409_s17 = smov [#allocation8]   ;;  %s1410_s20 = smov [#allocation11]  }
  0x19   :  { %s70_s18 = sshll.u32 %s1409_s17, 4  ;;  %s98_s21 = sshll.u32 %s1410_s20, 4  ;;  %s71_s18 = int_to_ptr.vmem [resolvable:$true] %s70_s18  ;;  %s99_s21 = int_to_ptr.vmem [resolvable:$true] %s98_s21 }
  0x1a   :  { %s1196_s24 = scalar_lea.hbm %s1732_s5, 1024 }
  0x1b   :  { %p1197_p8 = scmp.ne.s32.totalorder %s1732_s5, %s1196_s24  ;;  %p1200_p9 = scmp.lt.u32.totalorder %s1196_s24, %s1732_s5 }
  0x1d   :  { %p1202_p10 = pnand %p1200_p9, %p1197_p8 }
  0x1f   :  { %1205 = shalt.err (!%p1202_p10)
}
  0x20   :  { %s1206_s1 = scalar_lea.vmem %s71_s18, 1024  ;;  %p1211_p12 = scmp.lt.s32.totalorder %s71_s18, %s71_s18 }
  0x21   :  { %p1207_p11 = scmp.ne.s32.totalorder %s71_s18, %s1206_s1  ;;  %p1212_p13 = scmp.lt.s32.totalorder %s1206_s1, %s1206_s1 }
  0x23   :  { %p1213_p0 = por %p1212_p13, %p1211_p12 }
  0x25   :  { %p1214_p1 = pnand %p1213_p0, %p1207_p11 }
  0x27   :  { %1217 = shalt.err (!%p1214_p1)
}
  0x28   :  { %76 = dma.hbm_to_vmem [thread:$0]  %s1732_s5, 1024, %s71_s18, [#allocation9], %s1407_s28, %s1407_s28, %s1408_s29  }
  0x29   :  { %s1218_s17 = scalar_lea.hbm %s1736_s9, 1024 }
  0x2a   :  { %p1219_p2 = scmp.ne.s32.totalorder %s1736_s9, %s1218_s17  ;;  %p1222_p3 = scmp.lt.u32.totalorder %s1218_s17, %s1736_s9 }
  0x2c   :  { %p1224_p4 = pnand %p1222_p3, %p1219_p2 }
  0x2e   :  { %1227 = shalt.err (!%p1224_p4)
}
  0x2f   :  { %s1228_s25 = scalar_lea.vmem %s99_s21, 1024  ;;  %p1233_p6 = scmp.lt.s32.totalorder %s99_s21, %s99_s21 }
  0x30   :  { %p1229_p5 = scmp.ne.s32.totalorder %s99_s21, %s1228_s25  ;;  %p1234_p7 = scmp.lt.s32.totalorder %s1228_s25, %s1228_s25 }
  0x32   :  { %p1235_p8 = por %p1234_p7, %p1233_p6 }
  0x34   :  { %p1236_p9 = pnand %p1235_p8, %p1229_p5 }
  0x36   :  { %1239 = shalt.err (!%p1236_p9)
}
  0x37   :  { %104 = dma.hbm_to_vmem [thread:$0]  %s1736_s9, 1024, %s99_s21, [#allocation12], %s1407_s28, %s1407_s28, %s1408_s29  }
  0x38   :  { %s1411_s26 = smov [#allocation2]   ;;  %s1412_s1 = smov [#allocation7]  }
  0x39   :  { %s33_s27 = sshll.u32 %s1411_s26, 4  ;;  %s56_s19 = sshll.u32 %s1412_s1, 4  ;;  %s34_s27 = int_to_ptr.vmem [resolvable:$true] %s33_s27  ;;  %s57_s19 = int_to_ptr.vmem [resolvable:$true] %s56_s19 }
  0x3a   :  { %s1240_s15 = scalar_lea.hbm %s1727_s0, 128 }
  0x3b   :  { %p1241_p10 = scmp.ne.s32.totalorder %s1727_s0, %s1240_s15  ;;  %p1244_p11 = scmp.lt.u32.totalorder %s1240_s15, %s1727_s0 }
  0x3d   :  { %p1246_p12 = pnand %p1244_p11, %p1241_p10 }
  0x3f   :  { %1249 = shalt.err (!%p1246_p12)
}
  0x40   :  { %s1250_s9 = scalar_lea.vmem %s34_s27, 128  ;;  %p1255_p0 = scmp.lt.s32.totalorder %s34_s27, %s34_s27 }
  0x41   :  { %p1251_p13 = scmp.ne.s32.totalorder %s34_s27, %s1250_s9  ;;  %p1256_p1 = scmp.lt.s32.totalorder %s1250_s9, %s1250_s9 }
  0x43   :  { %p1257_p2 = por %p1256_p1, %p1255_p0 }
  0x45   :  { %p1258_p3 = pnand %p1257_p2, %p1251_p13 }
  0x47   :  { %1261 = shalt.err (!%p1258_p3)
}
  0x48   :  { %36 = dma.hbm_to_vmem [thread:$0]  %s1727_s0, 128, %s34_s27, [#allocation3]  }
  0x49   :  { %s1262_s18 = scalar_lea.hbm %s1730_s3, 1024 }
  0x4a   :  { %p1263_p4 = scmp.ne.s32.totalorder %s1730_s3, %s1262_s18  ;;  %p1266_p5 = scmp.lt.u32.totalorder %s1262_s18, %s1730_s3 }
  0x4c   :  { %p1268_p6 = pnand %p1266_p5, %p1263_p4 }
  0x4e   :  { %1271 = shalt.err (!%p1268_p6)
}
  0x4f   :  { %s1272_s15 = scalar_lea.vmem %s57_s19, 1024  ;;  %p1277_p8 = scmp.lt.s32.totalorder %s57_s19, %s57_s19 }
  0x50   :  { %p1273_p7 = scmp.ne.s32.totalorder %s57_s19, %s1272_s15  ;;  %p1278_p9 = scmp.lt.s32.totalorder %s1272_s15, %s1272_s15 }
  0x52   :  { %p1279_p10 = por %p1278_p9, %p1277_p8 }
  0x54   :  { %p1280_p11 = pnand %p1279_p10, %p1273_p7 }
  0x56   :  { %1283 = shalt.err (!%p1280_p11)
}
  0x57   :  { %62 = dma.hbm_to_vmem [thread:$0]  %s1730_s3, 1024, %s57_s19, [#allocation6], %s1407_s28, %s1407_s28, %s1408_s29  }
  0x58   :  { %s1413_s17 = smov [#allocation10]   ;;  %s1414_s22 = smov [#allocation13]  }
  0x59   :  { %s84_s20 = sshll.u32 %s1413_s17, 4  ;;  %s112_s23 = sshll.u32 %s1414_s22, 4  ;;  %s85_s20 = int_to_ptr.vmem [resolvable:$true] %s84_s20  ;;  %s113_s23 = int_to_ptr.vmem [resolvable:$true] %s112_s23 }
  0x5a   :  { %s1284_s24 = scalar_lea.hbm %s1734_s7, 1024 }
  0x5b   :  { %p1285_p12 = scmp.ne.s32.totalorder %s1734_s7, %s1284_s24  ;;  %p1288_p13 = scmp.lt.u32.totalorder %s1284_s24, %s1734_s7 }
  0x5d   :  { %p1290_p0 = pnand %p1288_p13, %p1285_p12 }
  0x5f   :  { %1293 = shalt.err (!%p1290_p0)
}
  0x60   :  { %s1294_s3 = scalar_lea.vmem %s85_s20, 1024  ;;  %p1299_p2 = scmp.lt.s32.totalorder %s85_s20, %s85_s20 }
  0x61   :  { %p1295_p1 = scmp.ne.s32.totalorder %s85_s20, %s1294_s3  ;;  %p1300_p3 = scmp.lt.s32.totalorder %s1294_s3, %s1294_s3 }
  0x63   :  { %p1301_p4 = por %p1300_p3, %p1299_p2 }
  0x65   :  { %p1302_p5 = pnand %p1301_p4, %p1295_p1 }
  0x67   :  { %1305 = shalt.err (!%p1302_p5)
}
  0x68   :  { %90 = dma.hbm_to_vmem [thread:$0]  %s1734_s7, 1024, %s85_s20, [#allocation9], %s1407_s28, %s1407_s28, %s1408_s29  }
  0x69   :  { %s1306_s15 = scalar_lea.hbm %s1738_s11, 1024 }
  0x6a   :  { %p1307_p6 = scmp.ne.s32.totalorder %s1738_s11, %s1306_s15  ;;  %p1310_p7 = scmp.lt.u32.totalorder %s1306_s15, %s1738_s11 }
  0x6c   :  { %p1312_p8 = pnand %p1310_p7, %p1307_p6 }
  0x6e   :  { %1315 = shalt.err (!%p1312_p8)
}
  0x6f   :  { %s1316_s9 = scalar_lea.vmem %s113_s23, 1024  ;;  %p1321_p10 = scmp.lt.s32.totalorder %s113_s23, %s113_s23 }
  0x70   :  { %p1317_p9 = scmp.ne.s32.totalorder %s113_s23, %s1316_s9  ;;  %p1322_p11 = scmp.lt.s32.totalorder %s1316_s9, %s1316_s9 }
  0x72   :  { %p1323_p12 = por %p1322_p11, %p1321_p10 }
  0x74   :  { %p1324_p13 = pnand %p1323_p12, %p1317_p9 }
  0x76   :  { %1327 = shalt.err (!%p1324_p13)
}
  0x77   :  { %118 = dma.hbm_to_vmem [thread:$0]  %s1738_s11, 1024, %s113_s23, [#allocation12], %s1407_s28, %s1407_s28, %s1408_s29  }
  0x78   :  { %1394 = dma.done.wait [#allocation3], 128  }
  0x79   :  { %1395 = vsyncadd [#allocation3], 4294967168 }
  0x7a   :  { %1396 = dma.done.wait [#allocation6], 2048  }
  0x7b   :  { %1397 = vsyncadd [#allocation6], 4294965248 }
  0x7c   :  { %1398 = dma.done.wait [#allocation9], 2048  }
  0x7d   :  { %1399 = vsyncadd [#allocation9], 4294965248 }
  0x7e   :  { %1400 = dma.done.wait [#allocation12], 2048  }
  0x7f   :  { %1401 = vsyncadd [#allocation12], 4294965248  ;;  %v1415_v0 = vmov 0.0   ;;  %vm1416_vm0 = vmmov 0   ;;  %v1126_v1 = vld [vmem:[#allocation5] sm:$0xff]   ;;  %v1127_v2 = vld [vmem:[#allocation5 + $0x8] sm:$0xff]  }
  0x80   :  { %992 = vmatprep.subr.bf16.mxu0 %v1415_v0  ;;  %1008 = vmatprep.mubr.msk.bf16.mxu0 %vm1416_vm0, %v1415_v0  ;;  %v1128_v3 = vld [vmem:[#allocation5 + $0x10] sm:$0xff]   ;;  %v1134_v4 = vld [vmem:[#allocation7] sm:$0xff]   ;;  %v1129_v5 = vld [vmem:[#allocation5 + $0x18] sm:$0xff]   ;;  %s1418_s26 = smov [#allocation14]  }
  0x81   :  { %1012 = vmatprep.subr.bf16.mxu1 %v1415_v0  ;;  %1028 = vmatprep.mubr.msk.bf16.mxu1 %vm1416_vm0, %v1415_v0  ;;  %v1135_v6 = vld [vmem:[#allocation7 + $0x8] sm:$0xff]   ;;  %v1130_v7 = vld [vmem:[#allocation5 + $0x20] sm:$0xff]   ;;  %v1136_v8 = vld [vmem:[#allocation7 + $0x10] sm:$0xff]  }
  0x82   :  { %993 = vmatpush3.bf16.msra.mxu0 %v1126_v1  ;;  %1013 = vmatpush3.bf16.msra.mxu1 %v1134_v4  ;;  %v1131_v9 = vld [vmem:[#allocation5 + $0x28] sm:$0xff]   ;;  %v1137_v10 = vld [vmem:[#allocation7 + $0x18] sm:$0xff]   ;;  %v1132_v11 = vld [vmem:[#allocation5 + $0x30] sm:$0xff]  }
  0x83   :  { %994 = vmatprep.subr.bf16.mxu0 %v1415_v0  ;;  %1014 = vmatprep.subr.bf16.mxu1 %v1415_v0  ;;  %v1138_v12 = vld [vmem:[#allocation7 + $0x20] sm:$0xff]   ;;  %v1133_v13 = vld [vmem:[#allocation5 + $0x38] sm:$0xff]   ;;  %v1139_v15 = vld [vmem:[#allocation7 + $0x28] sm:$0xff]  }
  0x84   :  { %v1617_v14 = vld [vmem:[#allocation2] sm:$0xff]  ;;  %v1140_v17 = vld [vmem:[#allocation7 + $0x30] sm:$0xff]   ;;  %v1142_v19 = vld [vmem:[#allocation8] sm:$0xff]  }
  0x85   :  { %v144_v16 = vpack.c.bf16 %v1617_v14, %v1617_v14  ;;  %v1141_v18 = vld [vmem:[#allocation7 + $0x38] sm:$0xff]   ;;  %v1143_v20 = vld [vmem:[#allocation8 + $0x8] sm:$0xff]   ;;  %v1144_v21 = vld [vmem:[#allocation8 + $0x10] sm:$0xff]  }
  0x86   :  { %995 = vmatpush3.bf16.msra.mxu0 %v1127_v2  ;;  %1015 = vmatpush3.bf16.msra.mxu1 %v1135_v6  ;;  %v1145_v22 = vld [vmem:[#allocation8 + $0x18] sm:$0xff]   ;;  %v1146_v23 = vld [vmem:[#allocation8 + $0x20] sm:$0xff]   ;;  %v1147_v24 = vld [vmem:[#allocation8 + $0x28] sm:$0xff]  }
  0x87   :  { %996 = vmatprep.subr.bf16.mxu0 %v1415_v0  ;;  %1016 = vmatprep.subr.bf16.mxu1 %v1415_v0  ;;  %v884_v25 = vld [vmem:[%s1729_s2] ss:$0 sm:$0xff]  ;;  %v1148_v33 = vld [vmem:[#allocation8 + $0x30] sm:$0xff]   ;;  %v1150_v35 = vld [vmem:[#allocation10] sm:$0xff]  }
  0x88   :  { %v1149_v34 = vld [vmem:[#allocation8 + $0x38] sm:$0xff]   ;;  %v1151_v36 = vld [vmem:[#allocation10 + $0x8] sm:$0xff]   ;;  %v1152_v37 = vld [vmem:[#allocation10 + $0x10] sm:$0xff]  }
  0x89   :  { %v1153_v38 = vld [vmem:[#allocation10 + $0x18] sm:$0xff]   ;;  %v1154_v39 = vld [vmem:[#allocation10 + $0x20] sm:$0xff]   ;;  %v1155_v40 = vld [vmem:[#allocation10 + $0x28] sm:$0xff]  }
  0x8a   :  { %997 = vmatpush3.bf16.msra.mxu0 %v1128_v3  ;;  %1017 = vmatpush3.bf16.msra.mxu1 %v1136_v8  ;;  %v1156_v41 = vld [vmem:[#allocation10 + $0x30] sm:$0xff]   ;;  %v893_v42 = vld [vmem:[%s1731_s4] ss:$0 sm:$0xff]  ;;  %v1158_v51 = vld [vmem:[#allocation11] sm:$0xff]  }
  0x8b   :  { %998 = vmatprep.subr.bf16.mxu0 %v1415_v0  ;;  %1018 = vmatprep.subr.bf16.mxu1 %v1415_v0  ;;  %v1157_v50 = vld [vmem:[#allocation10 + $0x38] sm:$0xff]   ;;  %v1159_v52 = vld [vmem:[#allocation11 + $0x8] sm:$0xff]   ;;  %v1160_v53 = vld [vmem:[#allocation11 + $0x10] sm:$0xff]  }
  0x8c   :  { %v1161_v54 = vld [vmem:[#allocation11 + $0x18] sm:$0xff]   ;;  %v1162_v55 = vld [vmem:[#allocation11 + $0x20] sm:$0xff]   ;;  %v1163_v56 = vld [vmem:[#allocation11 + $0x28] sm:$0xff]  }
  0x8d   :  { %v902_v57 = vld [vmem:[%s1733_s6] ss:$0 sm:$0xff]  ;;  %v1164_v1 = vld [vmem:[#allocation11 + $0x30] sm:$0xff]   ;;  %v1166_v3 = vld [vmem:[#allocation13] sm:$0xff]  }
  0x8e   :  { %999 = vmatpush3.bf16.msra.mxu0 %v1129_v5  ;;  %1019 = vmatpush3.bf16.msra.mxu1 %v1137_v10  ;;  %v1165_v2 = vld [vmem:[#allocation11 + $0x38] sm:$0xff]   ;;  %v1167_v4 = vld [vmem:[#allocation13 + $0x8] sm:$0xff]   ;;  %v1168_v5 = vld [vmem:[#allocation13 + $0x10] sm:$0xff]  }
  0x8f   :  { %1000 = vmatprep.subr.bf16.mxu0 %v1415_v0  ;;  %1020 = vmatprep.subr.bf16.mxu1 %v1415_v0  ;;  %v1169_v6 = vld [vmem:[#allocation13 + $0x18] sm:$0xff]   ;;  %v1171_v8 = vld [vmem:[#allocation13 + $0x28] sm:$0xff]  }
  0x92   :  { %1001 = vmatpush3.bf16.msra.mxu0 %v1130_v7  ;;  %1021 = vmatpush3.bf16.msra.mxu1 %v1138_v12  ;;  %v1170_v7 = vld [vmem:[#allocation13 + $0x20] sm:$0xff]  }
  0x93   :  { %1002 = vmatprep.subr.bf16.mxu0 %v1415_v0  ;;  %1022 = vmatprep.subr.bf16.mxu1 %v1415_v0 }
  0x96   :  { %1003 = vmatpush3.bf16.msra.mxu0 %v1131_v9  ;;  %1023 = vmatpush3.bf16.msra.mxu1 %v1139_v15  ;;  %v911_v9 = vld [vmem:[%s1735_s8] ss:$0 sm:$0xff] }
  0x97   :  { %1004 = vmatprep.subr.bf16.mxu0 %v1415_v0  ;;  %1024 = vmatprep.subr.bf16.mxu1 %v1415_v0 }
  0x9a   :  { %1005 = vmatpush3.bf16.msra.mxu0 %v1132_v11  ;;  %1025 = vmatpush3.bf16.msra.mxu1 %v1140_v17 }
  0x9b   :  { %1006 = vmatprep.subr.bf16.mxu0 %v1415_v0  ;;  %1026 = vmatprep.subr.bf16.mxu1 %v1415_v0 }
  0x9e   :  { %1007 = vmatpush3.bf16.msra.mxu0 %v1133_v13  ;;  %1027 = vmatpush3.bf16.msra.mxu1 %v1141_v18  ;;  %v1172_v18 = vld [vmem:[#allocation13 + $0x30] sm:$0xff]  }
  0x9f   :  { %1032 = vmatprep.subr.bf16.mxu0 %v1415_v0  ;;  %1052 = vmatprep.subr.bf16.mxu1 %v1415_v0 }
  0xa1   :  { %1009 = vmatmul.mubr.bf16.vlgmr.msra.gmra.mrb[0].mxu0 %v144_v16 }
  0xa2   :  { %1048 = vmatprep.mubr.msk.bf16.mxu0 %vm1416_vm0, %v1415_v0  ;;  %1033 = vmatpush3.bf16.msra.mxu0 %v1142_v19  ;;  %v1173_v19 = vld [vmem:[#allocation13 + $0x38] sm:$0xff]  }
  0xa3   :  { %1034 = vmatprep.subr.bf16.mxu0 %v1415_v0 }
  0xa6   :  { %1035 = vmatpush3.bf16.msra.mxu0 %v1143_v20  ;;  %v920_v20 = vld [vmem:[%s1737_s10] ss:$0 sm:$0xff]  ;;  %s1417_s10 = smov [#allocation15]  }
  0xa7   :  { %1036 = vmatprep.subr.bf16.mxu0 %v1415_v0  ;;  %s855_s18 = sshll.u32 %s1417_s10, 4  ;;  %s856_s18 = int_to_ptr.vmem [resolvable:$true] %s855_s18 }
  0xa8   :  { %s1328_s3 = scalar_lea.vmem %s856_s18, 64  ;;  %p1333_p1 = scmp.lt.s32.totalorder %s856_s18, %s856_s18 }
  0xa9   :  { %p1329_p0 = scmp.ne.s32.totalorder %s856_s18, %s1328_s3  ;;  %p1334_p2 = scmp.lt.s32.totalorder %s1328_s3, %s1328_s3 }
  0xaa   :  { %1037 = vmatpush3.bf16.msra.mxu0 %v1144_v21 }
  0xab   :  { %1038 = vmatprep.subr.bf16.mxu0 %v1415_v0  ;;  %p1335_p3 = por %p1334_p2, %p1333_p1 }
  0xad   :  { %p1336_p4 = pnand %p1335_p3, %p1329_p0 }
  0xae   :  { %1039 = vmatpush3.bf16.msra.mxu0 %v1145_v22 }
  0xaf   :  { %1040 = vmatprep.subr.bf16.mxu0 %v1415_v0 }
  0xb2   :  { %1041 = vmatpush3.bf16.msra.mxu0 %v1146_v23 }
  0xb3   :  { %1042 = vmatprep.subr.bf16.mxu0 %v1415_v0 }
  0xb6   :  { %1043 = vmatpush3.bf16.msra.mxu0 %v1147_v24 }
  0xb7   :  { %1044 = vmatprep.subr.bf16.mxu0 %v1415_v0 }
  0xba   :  { %1045 = vmatpush3.bf16.msra.mxu0 %v1148_v33 }
  0xbb   :  { %1046 = vmatprep.subr.bf16.mxu0 %v1415_v0 }
  0xbe   :  { %1047 = vmatpush3.bf16.msra.mxu0 %v1149_v34 }
  0xbf   :  { %1072 = vmatprep.subr.bf16.mxu0 %v1415_v0 }
 0x174   :  { %v250_v26 = vpop.f32.mrb[0].mxu0 }
 0x175   :  { %v251_v27 = vadd.f32 %v884_v25, %v250_v26  ;;  %v1010_v28 = vpop.f32.mrb[1].mxu0 }
 0x176   :  { %v253_v29 = vpop.f32.mrb[2].mxu0  ;;  %v929_v28 = vld [vmem:[%s1739_s12] ss:$0 sm:$0xff]  ;;  %s845_s12 = sshll.u32 %s1418_s26, 4  ;;  %s846_s12 = int_to_ptr.vmem [resolvable:$true] %s845_s12 }
 0x177   :  { %v256_v30 = vmax.f32 %v251_v27, 0.0  ;;  %v1011_v31 = vpop.f32.mrb[3].mxu0 }
 0x179   :  { %v257_v32 = vpack.c.bf16 %v256_v30, %v256_v30 }
 0x17b   :  { %1029 = vmatmul.mubr.bf16.vlgmr.msra.gmra.mrb[0].mxu1 %v257_v32 }
 0x17c   :  { %1068 = vmatprep.mubr.msk.bf16.mxu1 %vm1416_vm0, %v1415_v0  ;;  %1053 = vmatpush3.bf16.msra.mxu1 %v1150_v35 }
 0x17d   :  { %1054 = vmatprep.subr.bf16.mxu1 %v1415_v0 }
 0x180   :  { %1055 = vmatpush3.bf16.msra.mxu1 %v1151_v36 }
 0x181   :  { %1056 = vmatprep.subr.bf16.mxu1 %v1415_v0 }
 0x184   :  { %1057 = vmatpush3.bf16.msra.mxu1 %v1152_v37 }
 0x185   :  { %1058 = vmatprep.subr.bf16.mxu1 %v1415_v0 }
 0x188   :  { %1059 = vmatpush3.bf16.msra.mxu1 %v1153_v38 }
 0x189   :  { %1060 = vmatprep.subr.bf16.mxu1 %v1415_v0 }
 0x18c   :  { %1061 = vmatpush3.bf16.msra.mxu1 %v1154_v39 }
 0x18d   :  { %1062 = vmatprep.subr.bf16.mxu1 %v1415_v0 }
 0x190   :  { %1063 = vmatpush3.bf16.msra.mxu1 %v1155_v40 }
 0x191   :  { %1064 = vmatprep.subr.bf16.mxu1 %v1415_v0 }
 0x194   :  { %1065 = vmatpush3.bf16.msra.mxu1 %v1156_v41 }
 0x195   :  { %1066 = vmatprep.subr.bf16.mxu1 %v1415_v0 }
 0x198   :  { %1067 = vmatpush3.bf16.msra.mxu1 %v1157_v50 }
 0x199   :  { %1092 = vmatprep.subr.bf16.mxu1 %v1415_v0 }
 0x24e   :  { %v363_v43 = vpop.f32.mrb[0].mxu1 }
 0x24f   :  { %v364_v44 = vadd.f32 %v893_v42, %v363_v43  ;;  %v1030_v45 = vpop.f32.mrb[1].mxu1 }
 0x250   :  { %v366_v46 = vpop.f32.mrb[2].mxu1 }
 0x251   :  { %v369_v47 = vmax.f32 %v364_v44, 0.0  ;;  %v1031_v48 = vpop.f32.mrb[3].mxu1 }
 0x253   :  { %v370_v49 = vpack.c.bf16 %v369_v47, %v369_v47 }
 0x255   :  { %1049 = vmatmul.mubr.bf16.vlgmr.msra.gmra.mrb[4].mxu0 %v370_v49 }
 0x256   :  { %1088 = vmatprep.mubr.msk.bf16.mxu0 %vm1416_vm0, %v1415_v0  ;;  %1073 = vmatpush3.bf16.msra.mxu0 %v1158_v51 }
 0x257   :  { %1074 = vmatprep.subr.bf16.mxu0 %v1415_v0 }
 0x25a   :  { %1075 = vmatpush3.bf16.msra.mxu0 %v1159_v52 }
 0x25b   :  { %1076 = vmatprep.subr.bf16.mxu0 %v1415_v0 }
 0x25e   :  { %1077 = vmatpush3.bf16.msra.mxu0 %v1160_v53 }
 0x25f   :  { %1078 = vmatprep.subr.bf16.mxu0 %v1415_v0 }
 0x262   :  { %1079 = vmatpush3.bf16.msra.mxu0 %v1161_v54 }
 0x263   :  { %1080 = vmatprep.subr.bf16.mxu0 %v1415_v0 }
 0x266   :  { %1081 = vmatpush3.bf16.msra.mxu0 %v1162_v55 }
 0x267   :  { %1082 = vmatprep.subr.bf16.mxu0 %v1415_v0 }
 0x26a   :  { %1083 = vmatpush3.bf16.msra.mxu0 %v1163_v56 }
 0x26b   :  { %1084 = vmatprep.subr.bf16.mxu0 %v1415_v0 }
 0x26e   :  { %1085 = vmatpush3.bf16.msra.mxu0 %v1164_v1 }
 0x26f   :  { %1086 = vmatprep.subr.bf16.mxu0 %v1415_v0 }
 0x272   :  { %1087 = vmatpush3.bf16.msra.mxu0 %v1165_v2 }
 0x328   :  { %v476_v58 = vpop.f32.mrb[4].mxu0 }
 0x329   :  { %v1665_v59 = vadd.f32 %v902_v57, %v476_v58  ;;  %v1050_v60 = vpop.f32.mrb[5].mxu0 }
 0x32a   :  { %v479_v61 = vpop.f32.mrb[6].mxu0 }
 0x32b   :  { %v482_v62 = vpack.c.bf16 %v1665_v59, %v1665_v59  ;;  %v1051_v63 = vpop.f32.mrb[7].mxu0  ;;  %v828_v36 = vmul.f32 %v1665_v59, %v1665_v59 }
 0x32d   :  { %822 = vst [vmem:[#allocation15] sm:$0xf] %v482_v62  ;;  %1069 = vmatmul.mubr.bf16.vlgmr.msra.gmra.mrb[4].mxu1 %v482_v62 }
 0x32e   :  { %1108 = vmatprep.mubr.msk.bf16.mxu1 %vm1416_vm0, %v1415_v0  ;;  %1093 = vmatpush3.bf16.msra.mxu1 %v1166_v3 }
 0x32f   :  { %1094 = vmatprep.subr.bf16.mxu1 %v1415_v0 }
 0x332   :  { %1095 = vmatpush3.bf16.msra.mxu1 %v1167_v4 }
 0x333   :  { %1096 = vmatprep.subr.bf16.mxu1 %v1415_v0 }
 0x336   :  { %1097 = vmatpush3.bf16.msra.mxu1 %v1168_v5 }
 0x337   :  { %1098 = vmatprep.subr.bf16.mxu1 %v1415_v0 }
 0x33a   :  { %1099 = vmatpush3.bf16.msra.mxu1 %v1169_v6 }
 0x33b   :  { %1100 = vmatprep.subr.bf16.mxu1 %v1415_v0 }
 0x33e   :  { %1101 = vmatpush3.bf16.msra.mxu1 %v1170_v7 }
 0x33f   :  { %1102 = vmatprep.subr.bf16.mxu1 %v1415_v0 }
 0x342   :  { %1103 = vmatpush3.bf16.msra.mxu1 %v1171_v8 }
 0x343   :  { %1104 = vmatprep.subr.bf16.mxu1 %v1415_v0 }
 0x346   :  { %1105 = vmatpush3.bf16.msra.mxu1 %v1172_v18 }
 0x347   :  { %1106 = vmatprep.subr.bf16.mxu1 %v1415_v0 }
 0x34a   :  { %1107 = vmatpush3.bf16.msra.mxu1 %v1173_v19 }
 0x400   :  { %v588_v10 = vpop.f32.mrb[4].mxu1 }
 0x401   :  { %v589_v11 = vadd.f32 %v911_v9, %v588_v10  ;;  %v1070_v12 = vpop.f32.mrb[5].mxu1 }
 0x402   :  { %v591_v13 = vpop.f32.mrb[6].mxu1 }
 0x403   :  { %v594_v15 = vmax.f32 %v589_v11, 0.0  ;;  %v1071_v16 = vpop.f32.mrb[7].mxu1 }
 0x405   :  { %v595_v17 = vpack.c.bf16 %v594_v15, %v594_v15 }
 0x407   :  { %1089 = vmatmul.mubr.bf16.vlgmr.msra.gmra.mrb[8].mxu0 %v595_v17 }
 0x4da   :  { %v701_v21 = vpop.f32.mrb[8].mxu0 }
 0x4db   :  { %v702_v22 = vadd.f32 %v920_v20, %v701_v21  ;;  %v1090_v23 = vpop.f32.mrb[9].mxu0 }
 0x4dc   :  { %v704_v24 = vpop.f32.mrb[10].mxu0 }
 0x4dd   :  { %v707_v25 = vmax.f32 %v702_v22, 0.0  ;;  %v1091_v26 = vpop.f32.mrb[11].mxu0 }
 0x4df   :  { %v708_v27 = vpack.c.bf16 %v707_v25, %v707_v25 }
 0x4e1   :  { %1109 = vmatmul.mubr.bf16.vlgmr.msra.gmra.mrb[8].mxu1 %v708_v27 }
 0x5b4   :  { %v814_v29 = vpop.f32.mrb[8].mxu1 }
 0x5b5   :  { %v815_v0 = vadd.f32 %v929_v28, %v814_v29  ;;  %v1110_v30 = vpop.f32.mrb[9].mxu1 }
 0x5b6   :  { %v817_v31 = vpop.f32.mrb[10].mxu1 }
 0x5b7   :  { %v820_v32 = vpack.c.bf16 %v815_v0, %v815_v0  ;;  %v1111_v33 = vpop.f32.mrb[11].mxu1  ;;  %v823_v34 = vsub.f32 %v815_v0, %v1617_v14 }
 0x5b9   :  { %821 = vst [vmem:[#allocation14] sm:$0xf] %v820_v32  ;;  %v824_v35 = vmul.f32 %v823_v34, %v823_v34 }
 0x5bb   :  { %825 = vadd.xlane.f32.xlu0 %v824_v35 }
 0x5bf   :  { %829 = vadd.xlane.f32.xlu0 %v828_v36 }
 0x5c0   :  { %1339 = shalt.err (!%p1336_p4)
}
 0x5c1   :  { %s1340_s30 = scalar_lea.hbm %s1741_s14, 64 }
 0x5c2   :  { %p1341_p5 = scmp.ne.s32.totalorder %s1741_s14, %s1340_s30  ;;  %p1344_p6 = scmp.lt.u32.totalorder %s1340_s30, %s1741_s14 }
 0x5c4   :  { %p1346_p7 = pnand %p1344_p6, %p1341_p5 }
 0x5c6   :  { %1349 = shalt.err (!%p1346_p7)
}
 0x5c7   :  { %858 = dma.vmem_to_hbm [thread:$0]  %s856_s18, 64, %s1741_s14, [#allocation16]  }
 0x5c8   :  { %s1350_s9 = scalar_lea.vmem %s846_s12, 64  ;;  %p1355_p9 = scmp.lt.s32.totalorder %s846_s12, %s846_s12 }
 0x5c9   :  { %p1351_p8 = scmp.ne.s32.totalorder %s846_s12, %s1350_s9  ;;  %p1356_p10 = scmp.lt.s32.totalorder %s1350_s9, %s1350_s9 }
 0x5cb   :  { %p1357_p11 = por %p1356_p10, %p1355_p9 }
 0x5cd   :  { %p1358_p12 = pnand %p1357_p11, %p1351_p8 }
 0x5cf   :  { %1361 = shalt.err (!%p1358_p12)
}
 0x5d0   :  { %s1362_s11 = scalar_lea.hbm %s1740_s13, 64 }
 0x5d1   :  { %p1363_p13 = scmp.ne.s32.totalorder %s1740_s13, %s1362_s11  ;;  %p1366_p0 = scmp.lt.u32.totalorder %s1362_s11, %s1740_s13 }
 0x5d3   :  { %p1368_p1 = pnand %p1366_p0, %p1363_p13 }
 0x5d5   :  { %1371 = shalt.err (!%p1368_p1)
}
 0x5d6   :  { %848 = dma.vmem_to_hbm [thread:$0]  %s846_s12, 64, %s1740_s13, [#allocation4]   ;;  %v831_v14 = vlaneseq }
 0x5d7   :  { %s1419_s6 = smov [#allocation17]  }
 0x5d8   :  { %v832_v37 = vand.u32 127, %v831_v14  ;;  %s865_s21 = sshll.u32 %s1419_s6, 4  ;;  %s866_s21 = int_to_ptr.vmem [resolvable:$true] %s865_s21 }
 0x5d9   :  { %s1372_s24 = scalar_lea.vmem %s866_s21, 128  ;;  %p1377_p3 = scmp.lt.s32.totalorder %s866_s21, %s866_s21 }
 0x5da   :  { %vm833_vm1 = vcmp.eq.s32.totalorder %v832_v37, 0  ;;  %vm835_vm2 = vcmp.eq.s32.totalorder %v832_v37, 1  ;;  %p1373_p2 = scmp.ne.s32.totalorder %s866_s21, %s1372_s24  ;;  %p1378_p4 = scmp.lt.s32.totalorder %s1372_s24, %s1372_s24 }
 0x5dc   :  { %p1379_p5 = por %p1378_p4, %p1377_p3 }
 0x5de   :  { %p1380_p6 = pnand %p1379_p5, %p1373_p2 }
 0x648   :  { %v826_v38 = vpop.xlane.xlu0 %825 }
 0x649   :  { %v827_v39 = vmul.f32 0.03125, %v826_v38 }
 0x64b   :  { %v834_v41 = vsel %vm833_vm1, %v827_v39, 0.0 }
 0x64c   :  { %v830_v40 = vpop.xlane.xlu0 %829 }
 0x64d   :  { %v836_v42 = vsel %vm835_vm2, %v830_v40, 0.0 }
 0x64e   :  { %v837_v43 = vadd.f32 %v836_v42, %v834_v41 }
 0x650   :  { %838 = vst [vmem:[#allocation17] sm:$0xff] %v837_v43 }
 0x651   :  { %1383 = shalt.err (!%p1380_p6)
}
 0x652   :  { %s1745_s8 = sld [smem:[#allocation24_spill]] }
 0x658   :  { %s1384_s5 = scalar_lea.hbm %s1745_s8, 128 }
 0x659   :  { %p1385_p7 = scmp.ne.s32.totalorder %s1745_s8, %s1384_s5  ;;  %p1388_p8 = scmp.lt.u32.totalorder %s1384_s5, %s1745_s8 }
 0x65b   :  { %p1390_p9 = pnand %p1388_p8, %p1385_p7 }
 0x65d   :  { %1393 = shalt.err (!%p1390_p9)
}
 0x65e   :  { %868 = dma.vmem_to_hbm [thread:$0]  %s866_s21, 128, %s1745_s8, [#allocation16]  }
 0x65f   :  { %1402 = dma.done.wait [#allocation4], 64  }
 0x660   :  { %1403 = vsyncadd [#allocation4], 4294967232 }
 0x661   :  { %1404 = dma.done.wait [#allocation16], 192  }
 0x662   :  { %1405 = vsyncadd [#allocation16], 4294967104 }
 0x663   :  { %878 = vsyncpa [#allocation3], 1 }
 0x664   :  { %879 = vsyncpa [#allocation6], 1 }
 0x665   :  { %880 = vsyncpa [#allocation9], 1 }
 0x666   :  { %881 = vsyncpa [#allocation12], 1 }
 0x667   :  { %882 = vsyncpa [#allocation4], 1 }
 0x668   :  { %883 = vsyncpa [#allocation16], 1 }

// kernel: tpu_custom_call.1
= control target key start
LH: loop header
LB: loop body
LE: loop exit
PB: predicated region body
PF: predicated region fallthrough
CT: control target
= control target key end

     0   :  { %s1727_s0 = inlined_call_operand.hbm [shape: f32[8,128], index: 0, kind: input, shape index: {}]   ;;  %s1728_s1 = inlined_call_operand.hbm [shape: bf16[128,128], index: 1, kind: input, shape index: {}]   ;;  %s1729_s2 = inlined_call_operand.vmem [shape: f32[1,128], index: 2, kind: input, shape index: {}]   ;;  %s1730_s3 = inlined_call_operand.hbm [shape: bf16[128,128], index: 3, kind: input, shape index: {}]   ;;  %s1731_s4 = inlined_call_operand.vmem [shape: f32[1,128], index: 4, kind: input, shape index: {}]   ;;  %s1732_s5 = inlined_call_operand.hbm [shape: bf16[128,128], index: 5, kind: input, shape index: {}]   ;;  %s1733_s6 = inlined_call_operand.vmem [shape: f32[1,128], index: 6, kind: input, shape index: {}]   ;;  %s1734_s7 = inlined_call_operand.hbm [shape: bf16[128,128], index: 7, kind: input, shape index: {}]   ;;  %s1735_s8 = inlined_call_operand.vmem [shape: f32[1,128], index: 8, kind: input, shape index: {}]   ;;  %s1736_s9 = inlined_call_operand.hbm [shape: bf16[128,128], index: 9, kind: input, shape index: {}]   ;;  %s1737_s10 = inlined_call_operand.vmem [shape: f32[1,128], index: 10, kind: input, shape index: {}]   ;;  %s1738_s11 = inlined_call_operand.hbm [shape: bf16[128,128], index: 11, kind: input, shape index: {}]   ;;  %s1739_s12 = inlined_call_operand.vmem [shape: f32[1,128], index: 12, kind: input, shape index: {}]   ;;  %s1740_s13 = inlined_call_operand.hbm [shape: bf16[8,128], index: 13, kind: output, shape index: {0}]   ;;  %s1741_s14 = inlined_call_operand.hbm [shape: bf16[8,128], index: 14, kind: output, shape index: {1}]   ;;  %s1742_s15 = inlined_call_operand.hbm [shape: f32[8,128], index: 15, kind: output, shape index: {2}]  }
   0x1   :  { %1744 = sst [smem:[#allocation24_spill]] %s1742_s15 }
   0x2   :  { %21 = vsyncpa [#allocation3], 0 }
   0x3   :  { %22 = vsyncpa [#allocation6], 0 }
   0x4   :  { %23 = vsyncpa [#allocation9], 0 }
   0x5   :  { %24 = vsyncpa [#allocation12], 0 }
   0x6   :  { %25 = vsyncpa [#allocation4], 0 }
   0x7   :  { %26 = vsyncpa [#allocation16], 0  ;;  %s1406_s18 = smov [#allocation5]   ;;  %s1174_s22 = scalar_lea.hbm %s1728_s1, 1024 }
   0x8   :  { %s42_s19 = sshll.u32 %s1406_s18, 4  ;;  %p1175_p0 = scmp.ne.s32.totalorder %s1728_s1, %s1174_s22  ;;  %s43_s19 = int_to_ptr.vmem [resolvable:$true] %s42_s19 }
   0x9   :  { %p1178_p1 = scmp.lt.u32.totalorder %s1174_s22, %s1728_s1 }
   0xb   :  { %p1180_p2 = pnand %p1178_p1, %p1175_p0 }
   0xd   :  { %1183 = shalt.err (!%p1180_p2)
}
   0xe   :  { %s1184_s27 = scalar_lea.vmem %s43_s19, 1024  ;;  %p1189_p4 = scmp.lt.s32.totalorder %s43_s19, %s43_s19 }
   0xf   :  { %p1185_p3 = scmp.ne.s32.totalorder %s43_s19, %s1184_s27  ;;  %p1190_p5 = scmp.lt.s32.totalorder %s1184_s27, %s1184_s27 }
  0x11   :  { %p1191_p6 = por %p1190_p5, %p1189_p4 }
  0x13   :  { %p1192_p7 = pnand %p1191_p6, %p1185_p3 }
  0x15   :  { %1195 = shalt.err (!%p1192_p7)
}
  0x16   :  { %s1407_s28 = smov 64   ;;  %s1408_s29 = smov 4  }
  0x17   :  { %48 = dma.hbm_to_vmem [thread:$0]  %s1728_s1, 1024, %s43_s19, [#allocation6], %s1407_s28, %s1407_s28, %s1408_s29  }
  0x18   :  { %s1409_s17 = smov [#allocation8]   ;;  %s1410_s20 = smov [#allocation11]  }
  0x19   :  { %s70_s18 = sshll.u32 %s1409_s17, 4  ;;  %s98_s21 = sshll.u32 %s1410_s20, 4  ;;  %s71_s18 = int_to_ptr.vmem [resolvable:$true] %s70_s18  ;;  %s99_s21 = int_to_ptr.vmem [resolvable:$true] %s98_s21 }
  0x1a   :  { %s1196_s24 = scalar_lea.hbm %s1732_s5, 1024 }
  0x1b   :  { %p1197_p8 = scmp.ne.s32.totalorder %s1732_s5, %s1196_s24  ;;  %p1200_p9 = scmp.lt.u32.totalorder %s1196_s24, %s1732_s5 }
  0x1d   :  { %p1202_p10 = pnand %p1200_p9, %p1197_p8 }
  0x1f   :  { %1205 = shalt.err (!%p1202_p10)
}
  0x20   :  { %s1206_s1 = scalar_lea.vmem %s71_s18, 1024  ;;  %p1211_p12 = scmp.lt.s32.totalorder %s71_s18, %s71_s18 }
  0x21   :  { %p1207_p11 = scmp.ne.s32.totalorder %s71_s18, %s1206_s1  ;;  %p1212_p13 = scmp.lt.s32.totalorder %s1206_s1, %s1206_s1 }
  0x23   :  { %p1213_p0 = por %p1212_p13, %p1211_p12 }
  0x25   :  { %p1214_p1 = pnand %p1213_p0, %p1207_p11 }
  0x27   :  { %1217 = shalt.err (!%p1214_p1)
}
  0x28   :  { %76 = dma.hbm_to_vmem [thread:$0]  %s1732_s5, 1024, %s71_s18, [#allocation9], %s1407_s28, %s1407_s28, %s1408_s29  }
  0x29   :  { %s1218_s17 = scalar_lea.hbm %s1736_s9, 1024 }
  0x2a   :  { %p1219_p2 = scmp.ne.s32.totalorder %s1736_s9, %s1218_s17  ;;  %p1222_p3 = scmp.lt.u32.totalorder %s1218_s17, %s1736_s9 }
  0x2c   :  { %p1224_p4 = pnand %p1222_p3, %p1219_p2 }
  0x2e   :  { %1227 = shalt.err (!%p1224_p4)
}
  0x2f   :  { %s1228_s25 = scalar_lea.vmem %s99_s21, 1024  ;;  %p1233_p6 = scmp.lt.s32.totalorder %s99_s21, %s99_s21 }
  0x30   :  { %p1229_p5 = scmp.ne.s32.totalorder %s99_s21, %s1228_s25  ;;  %p1234_p7 = scmp.lt.s32.totalorder %s1228_s25, %s1228_s25 }
  0x32   :  { %p1235_p8 = por %p1234_p7, %p1233_p6 }
  0x34   :  { %p1236_p9 = pnand %p1235_p8, %p1229_p5 }
  0x36   :  { %1239 = shalt.err (!%p1236_p9)
}
  0x37   :  { %104 = dma.hbm_to_vmem [thread:$0]  %s1736_s9, 1024, %s99_s21, [#allocation12], %s1407_s28, %s1407_s28, %s1408_s29  }
  0x38   :  { %s1411_s26 = smov [#allocation2]   ;;  %s1412_s1 = smov [#allocation7]  }
  0x39   :  { %s33_s27 = sshll.u32 %s1411_s26, 4  ;;  %s56_s19 = sshll.u32 %s1412_s1, 4  ;;  %s34_s27 = int_to_ptr.vmem [resolvable:$true] %s33_s27  ;;  %s57_s19 = int_to_ptr.vmem [resolvable:$true] %s56_s19 }
  0x3a   :  { %s1240_s15 = scalar_lea.hbm %s1727_s0, 128 }
  0x3b   :  { %p1241_p10 = scmp.ne.s32.totalorder %s1727_s0, %s1240_s15  ;;  %p1244_p11 = scmp.lt.u32.totalorder %s1240_s15, %s1727_s0 }
  0x3d   :  { %p1246_p12 = pnand %p1244_p11, %p1241_p10 }
  0x3f   :  { %1249 = shalt.err (!%p1246_p12)
}
  0x40   :  { %s1250_s9 = scalar_lea.vmem %s34_s27, 128  ;;  %p1255_p0 = scmp.lt.s32.totalorder %s34_s27, %s34_s27 }
  0x41   :  { %p1251_p13 = scmp.ne.s32.totalorder %s34_s27, %s1250_s9  ;;  %p1256_p1 = scmp.lt.s32.totalorder %s1250_s9, %s1250_s9 }
  0x43   :  { %p1257_p2 = por %p1256_p1, %p1255_p0 }
  0x45   :  { %p1258_p3 = pnand %p1257_p2, %p1251_p13 }
  0x47   :  { %1261 = shalt.err (!%p1258_p3)
}
  0x48   :  { %36 = dma.hbm_to_vmem [thread:$0]  %s1727_s0, 128, %s34_s27, [#allocation3]  }
  0x49   :  { %s1262_s18 = scalar_lea.hbm %s1730_s3, 1024 }
  0x4a   :  { %p1263_p4 = scmp.ne.s32.totalorder %s1730_s3, %s1262_s18  ;;  %p1266_p5 = scmp.lt.u32.totalorder %s1262_s18, %s1730_s3 }
  0x4c   :  { %p1268_p6 = pnand %p1266_p5, %p1263_p4 }
  0x4e   :  { %1271 = shalt.err (!%p1268_p6)
}
  0x4f   :  { %s1272_s15 = scalar_lea.vmem %s57_s19, 1024  ;;  %p1277_p8 = scmp.lt.s32.totalorder %s57_s19, %s57_s19 }
  0x50   :  { %p1273_p7 = scmp.ne.s32.totalorder %s57_s19, %s1272_s15  ;;  %p1278_p9 = scmp.lt.s32.totalorder %s1272_s15, %s1272_s15 }
  0x52   :  { %p1279_p10 = por %p1278_p9, %p1277_p8 }
  0x54   :  { %p1280_p11 = pnand %p1279_p10, %p1273_p7 }
  0x56   :  { %1283 = shalt.err (!%p1280_p11)
}
  0x57   :  { %62 = dma.hbm_to_vmem [thread:$0]  %s1730_s3, 1024, %s57_s19, [#allocation6], %s1407_s28, %s1407_s28, %s1408_s29  }
  0x58   :  { %s1413_s17 = smov [#allocation10]   ;;  %s1414_s22 = smov [#allocation13]  }
  0x59   :  { %s84_s20 = sshll.u32 %s1413_s17, 4  ;;  %s112_s23 = sshll.u32 %s1414_s22, 4  ;;  %s85_s20 = int_to_ptr.vmem [resolvable:$true] %s84_s20  ;;  %s113_s23 = int_to_ptr.vmem [resolvable:$true] %s112_s23 }
  0x5a   :  { %s1284_s24 = scalar_lea.hbm %s1734_s7, 1024 }
  0x5b   :  { %p1285_p12 = scmp.ne.s32.totalorder %s1734_s7, %s1284_s24  ;;  %p1288_p13 = scmp.lt.u32.totalorder %s1284_s24, %s1734_s7 }
  0x5d   :  { %p1290_p0 = pnand %p1288_p13, %p1285_p12 }
  0x5f   :  { %1293 = shalt.err (!%p1290_p0)
}
  0x60   :  { %s1294_s3 = scalar_lea.vmem %s85_s20, 1024  ;;  %p1299_p2 = scmp.lt.s32.totalorder %s85_s20, %s85_s20 }
  0x61   :  { %p1295_p1 = scmp.ne.s32.totalorder %s85_s20, %s1294_s3  ;;  %p1300_p3 = scmp.lt.s32.totalorder %s1294_s3, %s1294_s3 }
  0x63   :  { %p1301_p4 = por %p1300_p3, %p1299_p2 }
  0x65   :  { %p1302_p5 = pnand %p1301_p4, %p1295_p1 }
  0x67   :  { %1305 = shalt.err (!%p1302_p5)
}
  0x68   :  { %90 = dma.hbm_to_vmem [thread:$0]  %s1734_s7, 1024, %s85_s20, [#allocation9], %s1407_s28, %s1407_s28, %s1408_s29  }
  0x69   :  { %s1306_s15 = scalar_lea.hbm %s1738_s11, 1024 }
  0x6a   :  { %p1307_p6 = scmp.ne.s32.totalorder %s1738_s11, %s1306_s15  ;;  %p1310_p7 = scmp.lt.u32.totalorder %s1306_s15, %s1738_s11 }
  0x6c   :  { %p1312_p8 = pnand %p1310_p7, %p1307_p6 }
  0x6e   :  { %1315 = shalt.err (!%p1312_p8)
}
  0x6f   :  { %s1316_s9 = scalar_lea.vmem %s113_s23, 1024  ;;  %p1321_p10 = scmp.lt.s32.totalorder %s113_s23, %s113_s23 }
  0x70   :  { %p1317_p9 = scmp.ne.s32.totalorder %s113_s23, %s1316_s9  ;;  %p1322_p11 = scmp.lt.s32.totalorder %s1316_s9, %s1316_s9 }
  0x72   :  { %p1323_p12 = por %p1322_p11, %p1321_p10 }
  0x74   :  { %p1324_p13 = pnand %p1323_p12, %p1317_p9 }
  0x76   :  { %1327 = shalt.err (!%p1324_p13)
}
  0x77   :  { %118 = dma.hbm_to_vmem [thread:$0]  %s1738_s11, 1024, %s113_s23, [#allocation12], %s1407_s28, %s1407_s28, %s1408_s29  }
  0x78   :  { %1394 = dma.done.wait [#allocation3], 128  }
  0x79   :  { %1395 = vsyncadd [#allocation3], 4294967168 }
  0x7a   :  { %1396 = dma.done.wait [#allocation6], 2048  }
  0x7b   :  { %1397 = vsyncadd [#allocation6], 4294965248 }
  0x7c   :  { %1398 = dma.done.wait [#allocation9], 2048  }
  0x7d   :  { %1399 = vsyncadd [#allocation9], 4294965248 }
  0x7e   :  { %1400 = dma.done.wait [#allocation12], 2048  }
  0x7f   :  { %1401 = vsyncadd [#allocation12], 4294965248  ;;  %v1415_v0 = vmov 0.0   ;;  %vm1416_vm0 = vmmov 0   ;;  %v1126_v1 = vld [vmem:[#allocation5] sm:$0xff]   ;;  %v1127_v2 = vld [vmem:[#allocation5 + $0x8] sm:$0xff]  }
  0x80   :  { %992 = vmatprep.subr.bf16.mxu0 %v1415_v0  ;;  %1008 = vmatprep.mubr.msk.bf16.mxu0 %vm1416_vm0, %v1415_v0  ;;  %v1128_v3 = vld [vmem:[#allocation5 + $0x10] sm:$0xff]   ;;  %v1134_v4 = vld [vmem:[#allocation7] sm:$0xff]   ;;  %v1129_v5 = vld [vmem:[#allocation5 + $0x18] sm:$0xff]   ;;  %s1418_s26 = smov [#allocation14]  }
  0x81   :  { %1012 = vmatprep.subr.bf16.mxu1 %v1415_v0  ;;  %1028 = vmatprep.mubr.msk.bf16.mxu1 %vm1416_vm0, %v1415_v0  ;;  %v1135_v6 = vld [vmem:[#allocation7 + $0x8] sm:$0xff]   ;;  %v1130_v7 = vld [vmem:[#allocation5 + $0x20] sm:$0xff]   ;;  %v1136_v8 = vld [vmem:[#allocation7 + $0x10] sm:$0xff]  }
  0x82   :  { %993 = vmatpush3.bf16.msra.mxu0 %v1126_v1  ;;  %1013 = vmatpush3.bf16.msra.mxu1 %v1134_v4  ;;  %v1131_v9 = vld [vmem:[#allocation5 + $0x28] sm:$0xff]   ;;  %v1137_v10 = vld [vmem:[#allocation7 + $0x18] sm:$0xff]   ;;  %v1132_v11 = vld [vmem:[#allocation5 + $0x30] sm:$0xff]  }
  0x83   :  { %994 = vmatprep.subr.bf16.mxu0 %v1415_v0  ;;  %1014 = vmatprep.subr.bf16.mxu1 %v1415_v0  ;;  %v1138_v12 = vld [vmem:[#allocation7 + $0x20] sm:$0xff]   ;;  %v1133_v13 = vld [vmem:[#allocation5 + $0x38] sm:$0xff]   ;;  %v1139_v15 = vld [vmem:[#allocation7 + $0x28] sm:$0xff]  }
  0x84   :  { %v1617_v14 = vld [vmem:[#allocation2] sm:$0xff]  ;;  %v1140_v17 = vld [vmem:[#allocation7 + $0x30] sm:$0xff]   ;;  %v1142_v19 = vld [vmem:[#allocation8] sm:$0xff]  }
  0x85   :  { %v144_v16 = vpack.c.bf16 %v1617_v14, %v1617_v14  ;;  %v1141_v18 = vld [vmem:[#allocation7 + $0x38] sm:$0xff]   ;;  %v1143_v20 = vld [vmem:[#allocation8 + $0x8] sm:$0xff]   ;;  %v1144_v21 = vld [vmem:[#allocation8 + $0x10] sm:$0xff]  }
  0x86   :  { %995 = vmatpush3.bf16.msra.mxu0 %v1127_v2  ;;  %1015 = vmatpush3.bf16.msra.mxu1 %v1135_v6  ;;  %v1145_v22 = vld [vmem:[#allocation8 + $0x18] sm:$0xff]   ;;  %v1146_v23 = vld [vmem:[#allocation8 + $0x20] sm:$0xff]   ;;  %v1147_v24 = vld [vmem:[#allocation8 + $0x28] sm:$0xff]  }
  0x87   :  { %996 = vmatprep.subr.bf16.mxu0 %v1415_v0  ;;  %1016 = vmatprep.subr.bf16.mxu1 %v1415_v0  ;;  %v884_v25 = vld [vmem:[%s1729_s2] ss:$0 sm:$0xff]  ;;  %v1148_v33 = vld [vmem:[#allocation8 + $0x30] sm:$0xff]   ;;  %v1150_v35 = vld [vmem:[#allocation10] sm:$0xff]  }
  0x88   :  { %v1149_v34 = vld [vmem:[#allocation8 + $0x38] sm:$0xff]   ;;  %v1151_v36 = vld [vmem:[#allocation10 + $0x8] sm:$0xff]   ;;  %v1152_v37 = vld [vmem:[#allocation10 + $0x10] sm:$0xff]  }
  0x89   :  { %v1153_v38 = vld [vmem:[#allocation10 + $0x18] sm:$0xff]   ;;  %v1154_v39 = vld [vmem:[#allocation10 + $0x20] sm:$0xff]   ;;  %v1155_v40 = vld [vmem:[#allocation10 + $0x28] sm:$0xff]  }
  0x8a   :  { %997 = vmatpush3.bf16.msra.mxu0 %v1128_v3  ;;  %1017 = vmatpush3.bf16.msra.mxu1 %v1136_v8  ;;  %v1156_v41 = vld [vmem:[#allocation10 + $0x30] sm:$0xff]   ;;  %v893_v42 = vld [vmem:[%s1731_s4] ss:$0 sm:$0xff]  ;;  %v1158_v51 = vld [vmem:[#allocation11] sm:$0xff]  }
  0x8b   :  { %998 = vmatprep.subr.bf16.mxu0 %v1415_v0  ;;  %1018 = vmatprep.subr.bf16.mxu1 %v1415_v0  ;;  %v1157_v50 = vld [vmem:[#allocation10 + $0x38] sm:$0xff]   ;;  %v1159_v52 = vld [vmem:[#allocation11 + $0x8] sm:$0xff]   ;;  %v1160_v53 = vld [vmem:[#allocation11 + $0x10] sm:$0xff]  }
  0x8c   :  { %v1161_v54 = vld [vmem:[#allocation11 + $0x18] sm:$0xff]   ;;  %v1162_v55 = vld [vmem:[#allocation11 + $0x20] sm:$0xff]   ;;  %v1163_v56 = vld [vmem:[#allocation11 + $0x28] sm:$0xff]  }
  0x8d   :  { %v902_v57 = vld [vmem:[%s1733_s6] ss:$0 sm:$0xff]  ;;  %v1164_v1 = vld [vmem:[#allocation11 + $0x30] sm:$0xff]   ;;  %v1166_v3 = vld [vmem:[#allocation13] sm:$0xff]  }
  0x8e   :  { %999 = vmatpush3.bf16.msra.mxu0 %v1129_v5  ;;  %1019 = vmatpush3.bf16.msra.mxu1 %v1137_v10  ;;  %v1165_v2 = vld [vmem:[#allocation11 + $0x38] sm:$0xff]   ;;  %v1167_v4 = vld [vmem:[#allocation13 + $0x8] sm:$0xff]   ;;  %v1168_v5 = vld [vmem:[#allocation13 + $0x10] sm:$0xff]  }
  0x8f   :  { %1000 = vmatprep.subr.bf16.mxu0 %v1415_v0  ;;  %1020 = vmatprep.subr.bf16.mxu1 %v1415_v0  ;;  %v1169_v6 = vld [vmem:[#allocation13 + $0x18] sm:$0xff]   ;;  %v1171_v8 = vld [vmem:[#allocation13 + $0x28] sm:$0xff]  }
  0x92   :  { %1001 = vmatpush3.bf16.msra.mxu0 %v1130_v7  ;;  %1021 = vmatpush3.bf16.msra.mxu1 %v1138_v12  ;;  %v1170_v7 = vld [vmem:[#allocation13 + $0x20] sm:$0xff]  }
  0x93   :  { %1002 = vmatprep.subr.bf16.mxu0 %v1415_v0  ;;  %1022 = vmatprep.subr.bf16.mxu1 %v1415_v0 }
  0x96   :  { %1003 = vmatpush3.bf16.msra.mxu0 %v1131_v9  ;;  %1023 = vmatpush3.bf16.msra.mxu1 %v1139_v15  ;;  %v911_v9 = vld [vmem:[%s1735_s8] ss:$0 sm:$0xff] }
  0x97   :  { %1004 = vmatprep.subr.bf16.mxu0 %v1415_v0  ;;  %1024 = vmatprep.subr.bf16.mxu1 %v1415_v0 }
  0x9a   :  { %1005 = vmatpush3.bf16.msra.mxu0 %v1132_v11  ;;  %1025 = vmatpush3.bf16.msra.mxu1 %v1140_v17 }
  0x9b   :  { %1006 = vmatprep.subr.bf16.mxu0 %v1415_v0  ;;  %1026 = vmatprep.subr.bf16.mxu1 %v1415_v0 }
  0x9e   :  { %1007 = vmatpush3.bf16.msra.mxu0 %v1133_v13  ;;  %1027 = vmatpush3.bf16.msra.mxu1 %v1141_v18  ;;  %v1172_v18 = vld [vmem:[#allocation13 + $0x30] sm:$0xff]  }
  0x9f   :  { %1032 = vmatprep.subr.bf16.mxu0 %v1415_v0  ;;  %1052 = vmatprep.subr.bf16.mxu1 %v1415_v0 }
  0xa1   :  { %1009 = vmatmul.mubr.bf16.vlgmr.msra.gmra.mrb[0].mxu0 %v144_v16 }
  0xa2   :  { %1048 = vmatprep.mubr.msk.bf16.mxu0 %vm1416_vm0, %v1415_v0  ;;  %1033 = vmatpush3.bf16.msra.mxu0 %v1142_v19  ;;  %v1173_v19 = vld [vmem:[#allocation13 + $0x38] sm:$0xff]  }
  0xa3   :  { %1034 = vmatprep.subr.bf16.mxu0 %v1415_v0 }
  0xa6   :  { %1035 = vmatpush3.bf16.msra.mxu0 %v1143_v20  ;;  %v920_v20 = vld [vmem:[%s1737_s10] ss:$0 sm:$0xff]  ;;  %s1417_s10 = smov [#allocation15]  }
  0xa7   :  { %1036 = vmatprep.subr.bf16.mxu0 %v1415_v0  ;;  %s855_s18 = sshll.u32 %s1417_s10, 4  ;;  %s856_s18 = int_to_ptr.vmem [resolvable:$true] %s855_s18 }
  0xa8   :  { %s1328_s3 = scalar_lea.vmem %s856_s18, 64  ;;  %p1333_p1 = scmp.lt.s32.totalorder %s856_s18, %s856_s18 }
  0xa9   :  { %p1329_p0 = scmp.ne.s32.totalorder %s856_s18, %s1328_s3  ;;  %p1334_p2 = scmp.lt.s32.totalorder %s1328_s3, %s1328_s3 }
  0xaa   :  { %1037 = vmatpush3.bf16.msra.mxu0 %v1144_v21 }
  0xab   :  { %1038 = vmatprep.subr.bf16.mxu0 %v1415_v0  ;;  %p1335_p3 = por %p1334_p2, %p1333_p1 }
  0xad   :  { %p1336_p4 = pnand %p1335_p3, %p1329_p0 }
  0xae   :  { %1039 = vmatpush3.bf16.msra.mxu0 %v1145_v22 }
  0xaf   :  { %1040 = vmatprep.subr.bf16.mxu0 %v1415_v0 }
  0xb2   :  { %1041 = vmatpush3.bf16.msra.mxu0 %v1146_v23 }
  0xb3   :  { %1042 = vmatprep.subr.bf16.mxu0 %v1415_v0 }
  0xb6   :  { %1043 = vmatpush3.bf16.msra.mxu0 %v1147_v24 }
  0xb7   :  { %1044 = vmatprep.subr.bf16.mxu0 %v1415_v0 }
  0xba   :  { %1045 = vmatpush3.bf16.msra.mxu0 %v1148_v33 }
  0xbb   :  { %1046 = vmatprep.subr.bf16.mxu0 %v1415_v0 }
  0xbe   :  { %1047 = vmatpush3.bf16.msra.mxu0 %v1149_v34 }
  0xbf   :  { %1072 = vmatprep.subr.bf16.mxu0 %v1415_v0 }
 0x174   :  { %v250_v26 = vpop.f32.mrb[0].mxu0 }
 0x175   :  { %v251_v27 = vadd.f32 %v884_v25, %v250_v26  ;;  %v1010_v28 = vpop.f32.mrb[1].mxu0 }
 0x176   :  { %v253_v29 = vpop.f32.mrb[2].mxu0  ;;  %v929_v28 = vld [vmem:[%s1739_s12] ss:$0 sm:$0xff]  ;;  %s845_s12 = sshll.u32 %s1418_s26, 4  ;;  %s846_s12 = int_to_ptr.vmem [resolvable:$true] %s845_s12 }
 0x177   :  { %v256_v30 = vmax.f32 %v251_v27, 0.0  ;;  %v1011_v31 = vpop.f32.mrb[3].mxu0 }
 0x179   :  { %v257_v32 = vpack.c.bf16 %v256_v30, %v256_v30 }
 0x17b   :  { %1029 = vmatmul.mubr.bf16.vlgmr.msra.gmra.mrb[0].mxu1 %v257_v32 }
 0x17c   :  { %1068 = vmatprep.mubr.msk.bf16.mxu1 %vm1416_vm0, %v1415_v0  ;;  %1053 = vmatpush3.bf16.msra.mxu1 %v1150_v35 }
 0x17d   :  { %1054 = vmatprep.subr.bf16.mxu1 %v1415_v0 }
 0x180   :  { %1055 = vmatpush3.bf16.msra.mxu1 %v1151_v36 }
 0x181   :  { %1056 = vmatprep.subr.bf16.mxu1 %v1415_v0 }
 0x184   :  { %1057 = vmatpush3.bf16.msra.mxu1 %v1152_v37 }
 0x185   :  { %1058 = vmatprep.subr.bf16.mxu1 %v1415_v0 }
 0x188   :  { %1059 = vmatpush3.bf16.msra.mxu1 %v1153_v38 }
 0x189   :  { %1060 = vmatprep.subr.bf16.mxu1 %v1415_v0 }
 0x18c   :  { %1061 = vmatpush3.bf16.msra.mxu1 %v1154_v39 }
 0x18d   :  { %1062 = vmatprep.subr.bf16.mxu1 %v1415_v0 }
 0x190   :  { %1063 = vmatpush3.bf16.msra.mxu1 %v1155_v40 }
 0x191   :  { %1064 = vmatprep.subr.bf16.mxu1 %v1415_v0 }
 0x194   :  { %1065 = vmatpush3.bf16.msra.mxu1 %v1156_v41 }
 0x195   :  { %1066 = vmatprep.subr.bf16.mxu1 %v1415_v0 }
 0x198   :  { %1067 = vmatpush3.bf16.msra.mxu1 %v1157_v50 }
 0x199   :  { %1092 = vmatprep.subr.bf16.mxu1 %v1415_v0 }
 0x24e   :  { %v363_v43 = vpop.f32.mrb[0].mxu1 }
 0x24f   :  { %v364_v44 = vadd.f32 %v893_v42, %v363_v43  ;;  %v1030_v45 = vpop.f32.mrb[1].mxu1 }
 0x250   :  { %v366_v46 = vpop.f32.mrb[2].mxu1 }
 0x251   :  { %v369_v47 = vmax.f32 %v364_v44, 0.0  ;;  %v1031_v48 = vpop.f32.mrb[3].mxu1 }
 0x253   :  { %v370_v49 = vpack.c.bf16 %v369_v47, %v369_v47 }
 0x255   :  { %1049 = vmatmul.mubr.bf16.vlgmr.msra.gmra.mrb[4].mxu0 %v370_v49 }
 0x256   :  { %1088 = vmatprep.mubr.msk.bf16.mxu0 %vm1416_vm0, %v1415_v0  ;;  %1073 = vmatpush3.bf16.msra.mxu0 %v1158_v51 }
 0x257   :  { %1074 = vmatprep.subr.bf16.mxu0 %v1415_v0 }
 0x25a   :  { %1075 = vmatpush3.bf16.msra.mxu0 %v1159_v52 }
 0x25b   :  { %1076 = vmatprep.subr.bf16.mxu0 %v1415_v0 }
 0x25e   :  { %1077 = vmatpush3.bf16.msra.mxu0 %v1160_v53 }
 0x25f   :  { %1078 = vmatprep.subr.bf16.mxu0 %v1415_v0 }
 0x262   :  { %1079 = vmatpush3.bf16.msra.mxu0 %v1161_v54 }
 0x263   :  { %1080 = vmatprep.subr.bf16.mxu0 %v1415_v0 }
 0x266   :  { %1081 = vmatpush3.bf16.msra.mxu0 %v1162_v55 }
 0x267   :  { %1082 = vmatprep.subr.bf16.mxu0 %v1415_v0 }
 0x26a   :  { %1083 = vmatpush3.bf16.msra.mxu0 %v1163_v56 }
 0x26b   :  { %1084 = vmatprep.subr.bf16.mxu0 %v1415_v0 }
 0x26e   :  { %1085 = vmatpush3.bf16.msra.mxu0 %v1164_v1 }
 0x26f   :  { %1086 = vmatprep.subr.bf16.mxu0 %v1415_v0 }
 0x272   :  { %1087 = vmatpush3.bf16.msra.mxu0 %v1165_v2 }
 0x328   :  { %v476_v58 = vpop.f32.mrb[4].mxu0 }
 0x329   :  { %v1665_v59 = vadd.f32 %v902_v57, %v476_v58  ;;  %v1050_v60 = vpop.f32.mrb[5].mxu0 }
 0x32a   :  { %v479_v61 = vpop.f32.mrb[6].mxu0 }
 0x32b   :  { %v482_v62 = vpack.c.bf16 %v1665_v59, %v1665_v59  ;;  %v1051_v63 = vpop.f32.mrb[7].mxu0  ;;  %v828_v36 = vmul.f32 %v1665_v59, %v1665_v59 }
 0x32d   :  { %822 = vst [vmem:[#allocation15] sm:$0xf] %v482_v62  ;;  %1069 = vmatmul.mubr.bf16.vlgmr.msra.gmra.mrb[4].mxu1 %v482_v62 }
 0x32e   :  { %1108 = vmatprep.mubr.msk.bf16.mxu1 %vm1416_vm0, %v1415_v0  ;;  %1093 = vmatpush3.bf16.msra.mxu1 %v1166_v3 }
 0x32f   :  { %1094 = vmatprep.subr.bf16.mxu1 %v1415_v0 }
 0x332   :  { %1095 = vmatpush3.bf16.msra.mxu1 %v1167_v4 }
 0x333   :  { %1096 = vmatprep.subr.bf16.mxu1 %v1415_v0 }
 0x336   :  { %1097 = vmatpush3.bf16.msra.mxu1 %v1168_v5 }
 0x337   :  { %1098 = vmatprep.subr.bf16.mxu1 %v1415_v0 }
 0x33a   :  { %1099 = vmatpush3.bf16.msra.mxu1 %v1169_v6 }
 0x33b   :  { %1100 = vmatprep.subr.bf16.mxu1 %v1415_v0 }
 0x33e   :  { %1101 = vmatpush3.bf16.msra.mxu1 %v1170_v7 }
 0x33f   :  { %1102 = vmatprep.subr.bf16.mxu1 %v1415_v0 }
 0x342   :  { %1103 = vmatpush3.bf16.msra.mxu1 %v1171_v8 }
 0x343   :  { %1104 = vmatprep.subr.bf16.mxu1 %v1415_v0 }
 0x346   :  { %1105 = vmatpush3.bf16.msra.mxu1 %v1172_v18 }
 0x347   :  { %1106 = vmatprep.subr.bf16.mxu1 %v1415_v0 }
 0x34a   :  { %1107 = vmatpush3.bf16.msra.mxu1 %v1173_v19 }
 0x400   :  { %v588_v10 = vpop.f32.mrb[4].mxu1 }
 0x401   :  { %v589_v11 = vadd.f32 %v911_v9, %v588_v10  ;;  %v1070_v12 = vpop.f32.mrb[5].mxu1 }
 0x402   :  { %v591_v13 = vpop.f32.mrb[6].mxu1 }
 0x403   :  { %v594_v15 = vmax.f32 %v589_v11, 0.0  ;;  %v1071_v16 = vpop.f32.mrb[7].mxu1 }
 0x405   :  { %v595_v17 = vpack.c.bf16 %v594_v15, %v594_v15 }
 0x407   :  { %1089 = vmatmul.mubr.bf16.vlgmr.msra.gmra.mrb[8].mxu0 %v595_v17 }
 0x4da   :  { %v701_v21 = vpop.f32.mrb[8].mxu0 }
 0x4db   :  { %v702_v22 = vadd.f32 %v920_v20, %v701_v21  ;;  %v1090_v23 = vpop.f32.mrb[9].mxu0 }
 0x4dc   :  { %v704_v24 = vpop.f32.mrb[10].mxu0 }
 0x4dd   :  { %v707_v25 = vmax.f32 %v702_v22, 0.0  ;;  %v1091_v26 = vpop.f32.mrb[11].mxu0 }
 0x4df   :  { %v708_v27 = vpack.c.bf16 %v707_v25, %v707_v25 }
 0x4e1   :  { %1109 = vmatmul.mubr.bf16.vlgmr.msra.gmra.mrb[8].mxu1 %v708_v27 }
 0x5b4   :  { %v814_v29 = vpop.f32.mrb[8].mxu1 }
 0x5b5   :  { %v815_v0 = vadd.f32 %v929_v28, %v814_v29  ;;  %v1110_v30 = vpop.f32.mrb[9].mxu1 }
 0x5b6   :  { %v817_v31 = vpop.f32.mrb[10].mxu1 }
 0x5b7   :  { %v820_v32 = vpack.c.bf16 %v815_v0, %v815_v0  ;;  %v1111_v33 = vpop.f32.mrb[11].mxu1  ;;  %v823_v34 = vsub.f32 %v815_v0, %v1617_v14 }
 0x5b9   :  { %821 = vst [vmem:[#allocation14] sm:$0xf] %v820_v32  ;;  %v824_v35 = vmul.f32 %v823_v34, %v823_v34 }
 0x5bb   :  { %825 = vadd.xlane.f32.xlu0 %v824_v35 }
 0x5bf   :  { %829 = vadd.xlane.f32.xlu0 %v828_v36 }
 0x5c0   :  { %1339 = shalt.err (!%p1336_p4)
}
 0x5c1   :  { %s1340_s30 = scalar_lea.hbm %s1741_s14, 64 }
 0x5c2   :  { %p1341_p5 = scmp.ne.s32.totalorder %s1741_s14, %s1340_s30  ;;  %p1344_p6 = scmp.lt.u32.totalorder %s1340_s30, %s1741_s14 }
 0x5c4   :  { %p1346_p7 = pnand %p1344_p6, %p1341_p5 }
 0x5c6   :  { %1349 = shalt.err (!%p1346_p7)
}
 0x5c7   :  { %858 = dma.vmem_to_hbm [thread:$0]  %s856_s18, 64, %s1741_s14, [#allocation16]  }
 0x5c8   :  { %s1350_s9 = scalar_lea.vmem %s846_s12, 64  ;;  %p1355_p9 = scmp.lt.s32.totalorder %s846_s12, %s846_s12 }
 0x5c9   :  { %p1351_p8 = scmp.ne.s32.totalorder %s846_s12, %s1350_s9  ;;  %p1356_p10 = scmp.lt.s32.totalorder %s1350_s9, %s1350_s9 }
 0x5cb   :  { %p1357_p11 = por %p1356_p10, %p1355_p9 }
 0x5cd   :  { %p1358_p12 = pnand %p1357_p11, %p1351_p8 }
 0x5cf   :  { %1361 = shalt.err (!%p1358_p12)
}
 0x5d0   :  { %s1362_s11 = scalar_lea.hbm %s1740_s13, 64 }
 0x5d1   :  { %p1363_p13 = scmp.ne.s32.totalorder %s1740_s13, %s1362_s11  ;;  %p1366_p0 = scmp.lt.u32.totalorder %s1362_s11, %s1740_s13 }
 0x5d3   :  { %p1368_p1 = pnand %p1366_p0, %p1363_p13 }
 0x5d5   :  { %1371 = shalt.err (!%p1368_p1)
}
 0x5d6   :  { %848 = dma.vmem_to_hbm [thread:$0]  %s846_s12, 64, %s1740_s13, [#allocation4]   ;;  %v831_v14 = vlaneseq }
 0x5d7   :  { %s1419_s6 = smov [#allocation17]  }
 0x5d8   :  { %v832_v37 = vand.u32 127, %v831_v14  ;;  %s865_s21 = sshll.u32 %s1419_s6, 4  ;;  %s866_s21 = int_to_ptr.vmem [resolvable:$true] %s865_s21 }
 0x5d9   :  { %s1372_s24 = scalar_lea.vmem %s866_s21, 128  ;;  %p1377_p3 = scmp.lt.s32.totalorder %s866_s21, %s866_s21 }
 0x5da   :  { %vm833_vm1 = vcmp.eq.s32.totalorder %v832_v37, 0  ;;  %vm835_vm2 = vcmp.eq.s32.totalorder %v832_v37, 1  ;;  %p1373_p2 = scmp.ne.s32.totalorder %s866_s21, %s1372_s24  ;;  %p1378_p4 = scmp.lt.s32.totalorder %s1372_s24, %s1372_s24 }
 0x5dc   :  { %p1379_p5 = por %p1378_p4, %p1377_p3 }
 0x5de   :  { %p1380_p6 = pnand %p1379_p5, %p1373_p2 }
 0x648   :  { %v826_v38 = vpop.xlane.xlu0 %825 }
 0x649   :  { %v827_v39 = vmul.f32 0.03125, %v826_v38 }
 0x64b   :  { %v834_v41 = vsel %vm833_vm1, %v827_v39, 0.0 }
 0x64c   :  { %v830_v40 = vpop.xlane.xlu0 %829 }
 0x64d   :  { %v836_v42 = vsel %vm835_vm2, %v830_v40, 0.0 }
 0x64e   :  { %v837_v43 = vadd.f32 %v836_v42, %v834_v41 }
 0x650   :  { %838 = vst [vmem:[#allocation17] sm:$0xff] %v837_v43 }
 0x651   :  { %1383 = shalt.err (!%p1380_p6)
}
 0x652   :  { %s1745_s8 = sld [smem:[#allocation24_spill]] }
 0x658   :  { %s1384_s5 = scalar_lea.hbm %s1745_s8, 128 }
 0x659   :  { %p1385_p7 = scmp.ne.s32.totalorder %s1745_s8, %s1384_s5  ;;  %p1388_p8 = scmp.lt.u32.totalorder %s1384_s5, %s1745_s8 }
 0x65b   :  { %p1390_p9 = pnand %p1388_p8, %p1385_p7 }
 0x65d   :  { %1393 = shalt.err (!%p1390_p9)
}
 0x65e   :  { %868 = dma.vmem_to_hbm [thread:$0]  %s866_s21, 128, %s1745_s8, [#allocation16]  }
 0x65f   :  { %1402 = dma.done.wait [#allocation4], 64  }
 0x660   :  { %1403 = vsyncadd [#allocation4], 4294967232 }
 0x661   :  { %1404 = dma.done.wait [#allocation16], 192  }
 0x662   :  { %1405 = vsyncadd [#allocation16], 4294967104 }
 0x663   :  { %878 = vsyncpa [#allocation3], 1 }
 0x664   :  { %879 = vsyncpa [#allocation6], 1 }
 0x665   :  { %880 = vsyncpa [#allocation9], 1 }
 0x666   :  { %881 = vsyncpa [#allocation12], 1 }
 0x667   :  { %882 = vsyncpa [#allocation4], 1 }
 0x668   :  { %883 = vsyncpa [#allocation16], 1 }

</bundles_post_ra>
